<compile_context>
chip_gen: v7x
topology: tpu7x:2x2x1
jax: 0.10.0
libtpu: 0.0.40
codegen_flags: <defaults>
</compile_context>

<pallas_src>
import functools

import numpy as np
import jax
import jax.numpy as jnp
from jax import lax
from jax.experimental import pallas as pl
from jax.experimental.pallas import tpu as pltpu


def _round_up(n, m):
    return (n + m - 1) // m * m


# ---------------------------------------------------------------------------
# Kernel 1: fused g|phi|theta 1x1-conv projection + 2x2 maxpool of g/phi.
# Grid: (B,).  One batch element per step.
# ---------------------------------------------------------------------------
def _proj_pool_kernel(x_ref, wall_ref, sel_ref, theta_ref, phi_ref, g_ref,
                      *, H, W, C2p, C8p):
    f32, bf16 = jnp.float32, jnp.bfloat16
    H2, W2 = H // 2, W // 2
    Cp2 = C2p + C8p

    # Fused projection (rows = [g | phi | theta]); bf16 MXU, f32 accumulation.
    proj = jnp.dot(wall_ref[...], x_ref[0].astype(bf16),
                   preferred_element_type=f32)                     # (Cp, HW)

    # theta needs no pooling: store full resolution (bf16).
    theta_ref[0] = proj[Cp2:, :].astype(bf16)

    gp = proj[:Cp2, :]                                             # (Cp2, HW) f32
    sel_even = sel_ref[0]                                          # (W, W2) 0/1 bf16
    sel_odd = sel_ref[1]

    # 2x2 maxpool: H-pairs via static lane slices + VPU max; W compaction via
    # tiny exact selection matmuls (bf16 rounding commutes with max, so the
    # stored result equals the f32 pool rounded once).
    for h2 in range(H2):
        r0 = gp[:, (2 * h2) * W:(2 * h2 + 1) * W]                  # (Cp2, W)
        r1 = gp[:, (2 * h2 + 1) * W:(2 * h2 + 2) * W]
        rmax = jnp.maximum(r0, r1).astype(bf16)                    # H-pooled pair
        ev = jnp.dot(rmax, sel_even, preferred_element_type=f32)   # (Cp2, W2)
        od = jnp.dot(rmax, sel_odd, preferred_element_type=f32)
        pooled = jnp.maximum(ev, od)                               # (Cp2, W2)
        g_ref[0, :, h2 * W2:(h2 + 1) * W2] = pooled[:C2p, :].astype(bf16)
        phi_ref[0, :, h2 * W2:(h2 + 1) * W2] = pooled[C2p:, :].astype(bf16)


# ---------------------------------------------------------------------------
# Kernel 2: attention per (batch, query tile).
# ---------------------------------------------------------------------------
def _attn_kernel(x_ref, theta_ref, phi_ref, g_ref, wa_ref, sigma_ref, o_ref):
    f32, bf16 = jnp.float32, jnp.bfloat16

    # scores^T: pooled keys on sublanes, queries on lanes.            (HW4, TQ)
    scores_t = lax.dot_general(phi_ref[0], theta_ref[0],
                               (((0,), (0,)), ((), ())),
                               preferred_element_type=f32)

    # softmax over pooled positions; stats in f32.
    m = jnp.max(scores_t, axis=0, keepdims=True)                   # (1, TQ)
    e = jnp.exp(scores_t - m)                                      # (HW4, TQ)
    inv = pl.reciprocal(jnp.sum(e, axis=0, keepdims=True), approx=True)

    # attn @ g with normalization deferred onto the smaller (C2p, TQ) tensor.
    ag = lax.dot_general(g_ref[0], e.astype(bf16),
                         (((1,), (0,)), ((), ())),
                         preferred_element_type=f32)               # (C2p, TQ)
    ag = ag * inv

    out_c = jnp.dot(wa_ref[...], ag.astype(bf16),
                    preferred_element_type=f32)                    # (C, TQ)

    # residual: x + sigma * attn_out, lane-dense store.
    o_ref[0] = x_ref[0] + sigma_ref[0] * out_c


def self_attention_pallas(x_nchw, wt_conv, wp_conv, wg_conv, wa_conv, sigma):
    """x_nchw: (B, C, H, W) f32; conv weights as PyTorch (out_ch, in_ch)."""
    B, C, H, W = x_nchw.shape
    assert C % 8 == 0 and H % 2 == 0 and W % 2 == 0
    HW = H * W
    H2, W2 = H // 2, W // 2
    HW4 = H2 * W2
    C8, C2 = C // 8, C // 2

    # Pad small channel counts to multiples of 16 (zero pads -> exact result,
    # aligned sublane slices, clean bf16 packing).
    C8p, C2p = _round_up(C8, 16), _round_up(C2, 16)
    Cp2 = C2p + C8p
    Cp = Cp2 + C8p

    x3 = x_nchw.reshape(B, C, HW).astype(jnp.float32)   # free reshape of NCHW

    # Fused projection weight rows = [g | phi | theta], zero-padded.
    wall = jnp.zeros((Cp, C), jnp.float32)
    wall = wall.at[:C2, :].set(wg_conv.astype(jnp.float32))
    wall = wall.at[C2p:C2p + C8, :].set(wp_conv.astype(jnp.float32))
    wall = wall.at[Cp2:Cp2 + C8, :].set(wt_conv.astype(jnp.float32))
    wall = wall.astype(jnp.bfloat16)

    wa = jnp.zeros((C, C2p), jnp.float32).at[:, :C2].set(
        wa_conv.astype(jnp.float32)).astype(jnp.bfloat16)

    # Tiny exact 0/1 selection matrices for the stride-2 width compaction.
    sel_np = np.zeros((2, W, W2), np.float32)
    sel_np[0, np.arange(0, W, 2), np.arange(W2)] = 1.0
    sel_np[1, np.arange(1, W, 2), np.arange(W2)] = 1.0
    sel = jnp.asarray(sel_np, jnp.bfloat16)

    sigma = sigma.astype(jnp.float32).reshape((1,))

    # ------------------- kernel 1: projection + pool (per batch) ------------
    vmem1 = (2 * C * HW * 4 + 2 * Cp * C * 2 + 2 * 2 * W * W2 * 2
             + 2 * C8p * HW * 2 + 2 * (C8p + C2p) * HW4 * 2
             + 4 * Cp * HW * 4)
    theta, phi_p, g_p = pl.pallas_call(
        functools.partial(_proj_pool_kernel, H=H, W=W, C2p=C2p, C8p=C8p),
        grid=(B,),
        in_specs=[
            pl.BlockSpec((1, C, HW), lambda b: (b, 0, 0)),     # x (full, per b)
            pl.BlockSpec((Cp, C), lambda b: (0, 0)),           # fused weights
            pl.BlockSpec((2, W, W2), lambda b: (0, 0, 0)),     # pool compaction
        ],
        out_specs=[
            pl.BlockSpec((1, C8p, HW), lambda b: (b, 0, 0)),   # theta
            pl.BlockSpec((1, C8p, HW4), lambda b: (b, 0, 0)),  # phi (pooled)
            pl.BlockSpec((1, C2p, HW4), lambda b: (b, 0, 0)),  # g (pooled)
        ],
        out_shape=(
            jax.ShapeDtypeStruct((B, C8p, HW), jnp.bfloat16),
            jax.ShapeDtypeStruct((B, C8p, HW4), jnp.bfloat16),
            jax.ShapeDtypeStruct((B, C2p, HW4), jnp.bfloat16),
        ),
        compiler_params=pltpu.CompilerParams(
            dimension_semantics=("parallel",),
            vmem_limit_bytes=int(min(64 * 2**20, max(32 * 2**20, 2 * vmem1)))),
        cost_estimate=pl.CostEstimate(
            flops=int(2 * B * Cp * C * HW + 2 * B * Cp2 * HW * W2),
            transcendentals=0,
            bytes_accessed=int(B * (C * HW * 4
                                    + (C8p * HW + (C8p + C2p) * HW4) * 2)
                               + Cp * C * 2)),
    )(x3, wall, sel)

    # ------------------- kernel 2: attention per (batch, query tile) --------
    TQ = 256 if HW % 256 == 0 else (128 if HW % 128 == 0 else HW)
    NQ = HW // TQ
    vmem2 = (4 * C * TQ * 4 + 2 * C8p * TQ * 2 + 2 * (C8p + C2p) * HW4 * 2
             + 2 * C * C2p * 2 + 4 * HW4 * TQ * 4 + 3 * C2p * TQ * 4
             + 2 * C * TQ * 4)
    flops2 = 2 * B * HW * HW4 * (C8p + C2p) + 2 * B * C * C2p * HW
    bytes2 = (B * (2 * C * HW * 4 + C8p * HW * 2
                   + NQ * (C8p + C2p) * HW4 * 2) + C * C2p * 2)
    out3 = pl.pallas_call(
        _attn_kernel,
        grid=(B, NQ),
        in_specs=[
            pl.BlockSpec((1, C, TQ), lambda b, q: (b, 0, q)),      # x query tile
            pl.BlockSpec((1, C8p, TQ), lambda b, q: (b, 0, q)),    # theta tile
            pl.BlockSpec((1, C8p, HW4), lambda b, q: (b, 0, 0)),   # pooled phi
            pl.BlockSpec((1, C2p, HW4), lambda b, q: (b, 0, 0)),   # pooled g
            pl.BlockSpec((C, C2p), lambda b, q: (0, 0)),           # wa
            pl.BlockSpec(memory_space=pltpu.MemorySpace.SMEM),     # sigma
        ],
        out_specs=pl.BlockSpec((1, C, TQ), lambda b, q: (b, 0, q)),
        out_shape=jax.ShapeDtypeStruct((B, C, HW), jnp.float32),
        compiler_params=pltpu.CompilerParams(
            dimension_semantics=("parallel", "parallel"),
            vmem_limit_bytes=int(min(64 * 2**20, max(32 * 2**20, 2 * vmem2)))),
        cost_estimate=pl.CostEstimate(
            flops=int(flops2),
            transcendentals=int(B * HW * HW4),
            bytes_accessed=int(bytes2)),
    )(x3, theta, phi_p, g_p, wa, sigma)

    return out3.reshape(B, C, H, W)


# ----- pure-numpy reference (exact PyTorch forward semantics, NCHW) -----
def _maxpool2x2_np(x):
    B, C, H, W = x.shape
    return x.reshape(B, C, H // 2, 2, W // 2, 2).max(axis=(3, 5))


def self_attention_ref_np(x, wt_conv, wp_conv, wg_conv, wa_conv, sigma):
    x = np.asarray(x, np.float64)
    wt, wp, wg, wa = (np.asarray(a, np.float64)
                      for a in (wt_conv, wp_conv, wg_conv, wa_conv))
    B, C, H, W = x.shape
    C8, C2 = C // 8, C // 2
    theta = np.einsum('oc,bchw->bohw', wt, x).reshape(B, C8, H * W)
    phi = _maxpool2x2_np(np.einsum('oc,bchw->bohw', wp, x)).reshape(B, C8, H * W // 4)
    scores = np.einsum('bcn,bcm->bnm', theta, phi)
    scores = scores - scores.max(axis=-1, keepdims=True)
    attn = np.exp(scores)
    attn = attn / attn.sum(axis=-1, keepdims=True)
    g = _maxpool2x2_np(np.einsum('oc,bchw->bohw', wg, x)).reshape(B, C2, H * W // 4)
    attn_g = np.einsum('bcm,bnm->bcn', g, attn).reshape(B, C2, H, W)
    attn_g = np.einsum('oc,bchw->bohw', wa, attn_g)
    return x + float(sigma[0]) * attn_g


if __name__ == "__main__":
    key = jax.random.PRNGKey(0)
    kx, kk1, kk2, kk3, kk4 = jax.random.split(key, 5)
    B, C, H, W = 2, 32, 16, 16
    C8, C2 = C // 8, C // 2

    x = jax.random.normal(kx, (B, C, H, W), jnp.float32)

    # Deterministic synthetic 1x1-conv weights as (out_ch, in_ch) matrices.
    # TODO(synk): spectral_norm parametrization and the conditional-input (c)
    # branch of make_conv_block are parameter-setup concerns, not forward
    # compute; plain deterministic weights are used here.
    wt_conv = jax.random.normal(kk1, (C8, C), jnp.float32) * 0.1
    wp_conv = jax.random.normal(kk2, (C8, C), jnp.float32) * 0.1
    wg_conv = jax.random.normal(kk3, (C2, C), jnp.float32) * 0.1
    wa_conv = jax.random.normal(kk4, (C, C2), jnp.float32) * 0.1
    # torch init sets sigma = 0 (output == x); use a nonzero deterministic
    # value so the attention path is actually exercised.
    sigma = jnp.array([0.1], jnp.float32)

    out = self_attention_pallas(x, wt_conv, wp_conv, wg_conv, wa_conv, sigma)
    out = jax.block_until_ready(out)

    ref = self_attention_ref_np(x, wt_conv, wp_conv, wg_conv, wa_conv, sigma)
    np.testing.assert_allclose(np.asarray(out, np.float64), ref,
                               rtol=2e-2, atol=2e-2)
    print("KERNEL_OK")
</pallas_src>

<mosaic_0001>
module attributes {stable_mosaic.version = 11 : i64} {
  func.func @_proj_pool_kernel(%arg0: i32, %arg1: memref<1x32x256xf32, #tpu.memory_space<vmem>>, %arg2: memref<48x32xbf16, #tpu.memory_space<vmem>>, %arg3: memref<2x16x8xbf16, #tpu.memory_space<vmem>>, %arg4: memref<1x16x256xbf16, #tpu.memory_space<vmem>>, %arg5: memref<1x16x64xbf16, #tpu.memory_space<vmem>>, %arg6: memref<1x16x64xbf16, #tpu.memory_space<vmem>>) attributes {dimension_semantics = [#tpu.dimension_semantics<parallel>], iteration_bounds = array<i64: 2>, scalar_prefetch = 0 : i64, scratch_operands = 0 : i64, tpu.core_type = #tpu.core_type<tc>, window_params = [{transform_indices = @transform_0, window_bounds = array<i64: 1, 32, 256>}, {pipeline_mode = #tpu.pipeline_mode<synchronous>, transform_indices = @transform_1, window_bounds = array<i64: 48, 32>}, {pipeline_mode = #tpu.pipeline_mode<synchronous>, transform_indices = @transform_2, window_bounds = array<i64: 2, 16, 8>}, {transform_indices = @transform_3, window_bounds = array<i64: 1, 16, 256>}, {transform_indices = @transform_4, window_bounds = array<i64: 1, 16, 64>}, {transform_indices = @transform_5, window_bounds = array<i64: 1, 16, 64>}]} {
    %c0 = arith.constant 0 : index
    %c0_0 = arith.constant 0 : index
    %0 = vector.load %arg2[%c0, %c0_0] : memref<48x32xbf16, #tpu.memory_space<vmem>>, vector<48x32xbf16>
    %c0_1 = arith.constant 0 : index
    %c0_2 = arith.constant 0 : index
    %c0_3 = arith.constant 0 : index
    %1 = vector.load %arg1[%c0_1, %c0_2, %c0_3] : memref<1x32x256xf32, #tpu.memory_space<vmem>>, vector<1x32x256xf32>
    %2 = vector.shape_cast %1 : vector<1x32x256xf32> to vector<32x256xf32>
    %3 = arith.truncf %2 : vector<32x256xf32> to vector<32x256xbf16>
    %cst = arith.constant dense<0.000000e+00> : vector<48x256xf32>
    %4 = tpu.matmul %0, %3, %cst {dimension_numbers = #tpu.dot_dimension_numbers<[1], [0], [0], [1], [0, 0, 1, 1], [], []>} : vector<48x32xbf16>, vector<32x256xbf16>, vector<48x256xf32> -> vector<48x256xf32>
    %5 = vector.extract_strided_slice %4 {offsets = [32, 0], sizes = [16, 256], strides = [1, 1]} : vector<48x256xf32> to vector<16x256xf32>
    %6 = arith.truncf %5 : vector<16x256xf32> to vector<16x256xbf16>
    %c0_4 = arith.constant 0 : index
    %c0_5 = arith.constant 0 : index
    %c0_6 = arith.constant 0 : index
    %7 = vector.load %arg4[%c0_4, %c0_5, %c0_6] : memref<1x16x256xbf16, #tpu.memory_space<vmem>>, vector<1x16x256xbf16>
    %8 = vector.shape_cast %7 : vector<1x16x256xbf16> to vector<16x256xbf16>
    %9 = vector.shape_cast %6 : vector<16x256xbf16> to vector<1x16x256xbf16>
    tpu.vector_store %arg4[%c0_4, %c0_5, %c0_6], %9 {strides = array<i32>} : memref<1x16x256xbf16, #tpu.memory_space<vmem>>, vector<1x16x256xbf16>,
    %10 = vector.extract_strided_slice %4 {offsets = [0, 0], sizes = [32, 256], strides = [1, 1]} : vector<48x256xf32> to vector<32x256xf32>
    %c0_7 = arith.constant 0 : index
    %c0_8 = arith.constant 0 : index
    %c0_9 = arith.constant 0 : index
    %11 = vector.load %arg3[%c0_7, %c0_8, %c0_9] : memref<2x16x8xbf16, #tpu.memory_space<vmem>>, vector<1x16x8xbf16>
    %12 = vector.shape_cast %11 : vector<1x16x8xbf16> to vector<16x8xbf16>
    %c1 = arith.constant 1 : index
    %c0_10 = arith.constant 0 : index
    %c0_11 = arith.constant 0 : index
    %13 = vector.load %arg3[%c1, %c0_10, %c0_11] : memref<2x16x8xbf16, #tpu.memory_space<vmem>>, vector<1x16x8xbf16>
    %14 = vector.shape_cast %13 : vector<1x16x8xbf16> to vector<16x8xbf16>
    %15 = vector.extract_strided_slice %10 {offsets = [0, 0], sizes = [32, 16], strides = [1, 1]} : vector<32x256xf32> to vector<32x16xf32>
    %16 = vector.extract_strided_slice %10 {offsets = [0, 16], sizes = [32, 16], strides = [1, 1]} : vector<32x256xf32> to vector<32x16xf32>
    %17 = arith.maximumf %15, %16 : vector<32x16xf32>
    %18 = arith.truncf %17 : vector<32x16xf32> to vector<32x16xbf16>
    %cst_12 = arith.constant dense<0.000000e+00> : vector<32x8xf32>
    %19 = tpu.matmul %18, %12, %cst_12 {dimension_numbers = #tpu.dot_dimension_numbers<[1], [0], [0], [1], [0, 0, 1, 1], [], []>} : vector<32x16xbf16>, vector<16x8xbf16>, vector<32x8xf32> -> vector<32x8xf32>
    %cst_13 = arith.constant dense<0.000000e+00> : vector<32x8xf32>
    %20 = tpu.matmul %18, %14, %cst_13 {dimension_numbers = #tpu.dot_dimension_numbers<[1], [0], [0], [1], [0, 0, 1, 1], [], []>} : vector<32x16xbf16>, vector<16x8xbf16>, vector<32x8xf32> -> vector<32x8xf32>
    %21 = arith.maximumf %19, %20 : vector<32x8xf32>
    %22 = vector.extract_strided_slice %21 {offsets = [0, 0], sizes = [16, 8], strides = [1, 1]} : vector<32x8xf32> to vector<16x8xf32>
    %23 = arith.truncf %22 : vector<16x8xf32> to vector<16x8xbf16>
    %c0_14 = arith.constant 0 : index
    %c0_15 = arith.constant 0 : index
    %c0_16 = arith.constant 0 : index
    %24 = vector.load %arg6[%c0_14, %c0_15, %c0_16] : memref<1x16x64xbf16, #tpu.memory_space<vmem>>, vector<1x16x8xbf16>
    %25 = vector.shape_cast %24 : vector<1x16x8xbf16> to vector<16x8xbf16>
    %26 = vector.shape_cast %23 : vector<16x8xbf16> to vector<1x16x8xbf16>
    tpu.vector_store %arg6[%c0_14, %c0_15, %c0_16], %26 {strides = array<i32>} : memref<1x16x64xbf16, #tpu.memory_space<vmem>>, vector<1x16x8xbf16>,
    %27 = vector.extract_strided_slice %21 {offsets = [16, 0], sizes = [16, 8], strides = [1, 1]} : vector<32x8xf32> to vector<16x8xf32>
    %28 = arith.truncf %27 : vector<16x8xf32> to vector<16x8xbf16>
    %c0_17 = arith.constant 0 : index
    %c0_18 = arith.constant 0 : index
    %c0_19 = arith.constant 0 : index
    %29 = vector.load %arg5[%c0_17, %c0_18, %c0_19] : memref<1x16x64xbf16, #tpu.memory_space<vmem>>, vector<1x16x8xbf16>
    %30 = vector.shape_cast %29 : vector<1x16x8xbf16> to vector<16x8xbf16>
    %31 = vector.shape_cast %28 : vector<16x8xbf16> to vector<1x16x8xbf16>
    tpu.vector_store %arg5[%c0_17, %c0_18, %c0_19], %31 {strides = array<i32>} : memref<1x16x64xbf16, #tpu.memory_space<vmem>>, vector<1x16x8xbf16>,
    %32 = vector.extract_strided_slice %10 {offsets = [0, 32], sizes = [32, 16], strides = [1, 1]} : vector<32x256xf32> to vector<32x16xf32>
    %33 = vector.extract_strided_slice %10 {offsets = [0, 48], sizes = [32, 16], strides = [1, 1]} : vector<32x256xf32> to vector<32x16xf32>
    %34 = arith.maximumf %32, %33 : vector<32x16xf32>
    %35 = arith.truncf %34 : vector<32x16xf32> to vector<32x16xbf16>
    %cst_20 = arith.constant dense<0.000000e+00> : vector<32x8xf32>
    %36 = tpu.matmul %35, %12, %cst_20 {dimension_numbers = #tpu.dot_dimension_numbers<[1], [0], [0], [1], [0, 0, 1, 1], [], []>} : vector<32x16xbf16>, vector<16x8xbf16>, vector<32x8xf32> -> vector<32x8xf32>
    %cst_21 = arith.constant dense<0.000000e+00> : vector<32x8xf32>
    %37 = tpu.matmul %35, %14, %cst_21 {dimension_numbers = #tpu.dot_dimension_numbers<[1], [0], [0], [1], [0, 0, 1, 1], [], []>} : vector<32x16xbf16>, vector<16x8xbf16>, vector<32x8xf32> -> vector<32x8xf32>
    %38 = arith.maximumf %36, %37 : vector<32x8xf32>
    %39 = vector.extract_strided_slice %38 {offsets = [0, 0], sizes = [16, 8], strides = [1, 1]} : vector<32x8xf32> to vector<16x8xf32>
    %40 = arith.truncf %39 : vector<16x8xf32> to vector<16x8xbf16>
    %c0_22 = arith.constant 0 : index
    %c0_23 = arith.constant 0 : index
    %c8 = arith.constant 8 : index
    %41 = vector.load %arg6[%c0_22, %c0_23, %c8] : memref<1x16x64xbf16, #tpu.memory_space<vmem>>, vector<1x16x8xbf16>
    %42 = vector.shape_cast %41 : vector<1x16x8xbf16> to vector<16x8xbf16>
    %43 = vector.shape_cast %40 : vector<16x8xbf16> to vector<1x16x8xbf16>
    tpu.vector_store %arg6[%c0_22, %c0_23, %c8], %43 {strides = array<i32>} : memref<1x16x64xbf16, #tpu.memory_space<vmem>>, vector<1x16x8xbf16>,
    %44 = vector.extract_strided_slice %38 {offsets = [16, 0], sizes = [16, 8], strides = [1, 1]} : vector<32x8xf32> to vector<16x8xf32>
    %45 = arith.truncf %44 : vector<16x8xf32> to vector<16x8xbf16>
    %c0_24 = arith.constant 0 : index
    %c0_25 = arith.constant 0 : index
    %c8_26 = arith.constant 8 : index
    %46 = vector.load %arg5[%c0_24, %c0_25, %c8_26] : memref<1x16x64xbf16, #tpu.memory_space<vmem>>, vector<1x16x8xbf16>
    %47 = vector.shape_cast %46 : vector<1x16x8xbf16> to vector<16x8xbf16>
    %48 = vector.shape_cast %45 : vector<16x8xbf16> to vector<1x16x8xbf16>
    tpu.vector_store %arg5[%c0_24, %c0_25, %c8_26], %48 {strides = array<i32>} : memref<1x16x64xbf16, #tpu.memory_space<vmem>>, vector<1x16x8xbf16>,
    %49 = vector.extract_strided_slice %10 {offsets = [0, 64], sizes = [32, 16], strides = [1, 1]} : vector<32x256xf32> to vector<32x16xf32>
    %50 = vector.extract_strided_slice %10 {offsets = [0, 80], sizes = [32, 16], strides = [1, 1]} : vector<32x256xf32> to vector<32x16xf32>
    %51 = arith.maximumf %49, %50 : vector<32x16xf32>
    %52 = arith.truncf %51 : vector<32x16xf32> to vector<32x16xbf16>
    %cst_27 = arith.constant dense<0.000000e+00> : vector<32x8xf32>
    %53 = tpu.matmul %52, %12, %cst_27 {dimension_numbers = #tpu.dot_dimension_numbers<[1], [0], [0], [1], [0, 0, 1, 1], [], []>} : vector<32x16xbf16>, vector<16x8xbf16>, vector<32x8xf32> -> vector<32x8xf32>
    %cst_28 = arith.constant dense<0.000000e+00> : vector<32x8xf32>
    %54 = tpu.matmul %52, %14, %cst_28 {dimension_numbers = #tpu.dot_dimension_numbers<[1], [0], [0], [1], [0, 0, 1, 1], [], []>} : vector<32x16xbf16>, vector<16x8xbf16>, vector<32x8xf32> -> vector<32x8xf32>
    %55 = arith.maximumf %53, %54 : vector<32x8xf32>
    %56 = vector.extract_strided_slice %55 {offsets = [0, 0], sizes = [16, 8], strides = [1, 1]} : vector<32x8xf32> to vector<16x8xf32>
    %57 = arith.truncf %56 : vector<16x8xf32> to vector<16x8xbf16>
    %c0_29 = arith.constant 0 : index
    %c0_30 = arith.constant 0 : index
    %c16 = arith.constant 16 : index
    %58 = vector.load %arg6[%c0_29, %c0_30, %c16] : memref<1x16x64xbf16, #tpu.memory_space<vmem>>, vector<1x16x8xbf16>
    %59 = vector.shape_cast %58 : vector<1x16x8xbf16> to vector<16x8xbf16>
    %60 = vector.shape_cast %57 : vector<16x8xbf16> to vector<1x16x8xbf16>
    tpu.vector_store %arg6[%c0_29, %c0_30, %c16], %60 {strides = array<i32>} : memref<1x16x64xbf16, #tpu.memory_space<vmem>>, vector<1x16x8xbf16>,
    %61 = vector.extract_strided_slice %55 {offsets = [16, 0], sizes = [16, 8], strides = [1, 1]} : vector<32x8xf32> to vector<16x8xf32>
    %62 = arith.truncf %61 : vector<16x8xf32> to vector<16x8xbf16>
    %c0_31 = arith.constant 0 : index
    %c0_32 = arith.constant 0 : index
    %c16_33 = arith.constant 16 : index
    %63 = vector.load %arg5[%c0_31, %c0_32, %c16_33] : memref<1x16x64xbf16, #tpu.memory_space<vmem>>, vector<1x16x8xbf16>
    %64 = vector.shape_cast %63 : vector<1x16x8xbf16> to vector<16x8xbf16>
    %65 = vector.shape_cast %62 : vector<16x8xbf16> to vector<1x16x8xbf16>
    tpu.vector_store %arg5[%c0_31, %c0_32, %c16_33], %65 {strides = array<i32>} : memref<1x16x64xbf16, #tpu.memory_space<vmem>>, vector<1x16x8xbf16>,
    %66 = vector.extract_strided_slice %10 {offsets = [0, 96], sizes = [32, 16], strides = [1, 1]} : vector<32x256xf32> to vector<32x16xf32>
    %67 = vector.extract_strided_slice %10 {offsets = [0, 112], sizes = [32, 16], strides = [1, 1]} : vector<32x256xf32> to vector<32x16xf32>
    %68 = arith.maximumf %66, %67 : vector<32x16xf32>
    %69 = arith.truncf %68 : vector<32x16xf32> to vector<32x16xbf16>
    %cst_34 = arith.constant dense<0.000000e+00> : vector<32x8xf32>
    %70 = tpu.matmul %69, %12, %cst_34 {dimension_numbers = #tpu.dot_dimension_numbers<[1], [0], [0], [1], [0, 0, 1, 1], [], []>} : vector<32x16xbf16>, vector<16x8xbf16>, vector<32x8xf32> -> vector<32x8xf32>
    %cst_35 = arith.constant dense<0.000000e+00> : vector<32x8xf32>
    %71 = tpu.matmul %69, %14, %cst_35 {dimension_numbers = #tpu.dot_dimension_numbers<[1], [0], [0], [1], [0, 0, 1, 1], [], []>} : vector<32x16xbf16>, vector<16x8xbf16>, vector<32x8xf32> -> vector<32x8xf32>
    %72 = arith.maximumf %70, %71 : vector<32x8xf32>
    %73 = vector.extract_strided_slice %72 {offsets = [0, 0], sizes = [16, 8], strides = [1, 1]} : vector<32x8xf32> to vector<16x8xf32>
    %74 = arith.truncf %73 : vector<16x8xf32> to vector<16x8xbf16>
    %c0_36 = arith.constant 0 : index
    %c0_37 = arith.constant 0 : index
    %c24 = arith.constant 24 : index
    %75 = vector.load %arg6[%c0_36, %c0_37, %c24] : memref<1x16x64xbf16, #tpu.memory_space<vmem>>, vector<1x16x8xbf16>
    %76 = vector.shape_cast %75 : vector<1x16x8xbf16> to vector<16x8xbf16>
    %77 = vector.shape_cast %74 : vector<16x8xbf16> to vector<1x16x8xbf16>
    tpu.vector_store %arg6[%c0_36, %c0_37, %c24], %77 {strides = array<i32>} : memref<1x16x64xbf16, #tpu.memory_space<vmem>>, vector<1x16x8xbf16>,
    %78 = vector.extract_strided_slice %72 {offsets = [16, 0], sizes = [16, 8], strides = [1, 1]} : vector<32x8xf32> to vector<16x8xf32>
    %79 = arith.truncf %78 : vector<16x8xf32> to vector<16x8xbf16>
    %c0_38 = arith.constant 0 : index
    %c0_39 = arith.constant 0 : index
    %c24_40 = arith.constant 24 : index
    %80 = vector.load %arg5[%c0_38, %c0_39, %c24_40] : memref<1x16x64xbf16, #tpu.memory_space<vmem>>, vector<1x16x8xbf16>
    %81 = vector.shape_cast %80 : vector<1x16x8xbf16> to vector<16x8xbf16>
    %82 = vector.shape_cast %79 : vector<16x8xbf16> to vector<1x16x8xbf16>
    tpu.vector_store %arg5[%c0_38, %c0_39, %c24_40], %82 {strides = array<i32>} : memref<1x16x64xbf16, #tpu.memory_space<vmem>>, vector<1x16x8xbf16>,
    %83 = vector.extract_strided_slice %10 {offsets = [0, 128], sizes = [32, 16], strides = [1, 1]} : vector<32x256xf32> to vector<32x16xf32>
    %84 = vector.extract_strided_slice %10 {offsets = [0, 144], sizes = [32, 16], strides = [1, 1]} : vector<32x256xf32> to vector<32x16xf32>
    %85 = arith.maximumf %83, %84 : vector<32x16xf32>
    %86 = arith.truncf %85 : vector<32x16xf32> to vector<32x16xbf16>
    %cst_41 = arith.constant dense<0.000000e+00> : vector<32x8xf32>
    %87 = tpu.matmul %86, %12, %cst_41 {dimension_numbers = #tpu.dot_dimension_numbers<[1], [0], [0], [1], [0, 0, 1, 1], [], []>} : vector<32x16xbf16>, vector<16x8xbf16>, vector<32x8xf32> -> vector<32x8xf32>
    %cst_42 = arith.constant dense<0.000000e+00> : vector<32x8xf32>
    %88 = tpu.matmul %86, %14, %cst_42 {dimension_numbers = #tpu.dot_dimension_numbers<[1], [0], [0], [1], [0, 0, 1, 1], [], []>} : vector<32x16xbf16>, vector<16x8xbf16>, vector<32x8xf32> -> vector<32x8xf32>
    %89 = arith.maximumf %87, %88 : vector<32x8xf32>
    %90 = vector.extract_strided_slice %89 {offsets = [0, 0], sizes = [16, 8], strides = [1, 1]} : vector<32x8xf32> to vector<16x8xf32>
    %91 = arith.truncf %90 : vector<16x8xf32> to vector<16x8xbf16>
    %c0_43 = arith.constant 0 : index
    %c0_44 = arith.constant 0 : index
    %c32 = arith.constant 32 : index
    %92 = vector.load %arg6[%c0_43, %c0_44, %c32] : memref<1x16x64xbf16, #tpu.memory_space<vmem>>, vector<1x16x8xbf16>
    %93 = vector.shape_cast %92 : vector<1x16x8xbf16> to vector<16x8xbf16>
    %94 = vector.shape_cast %91 : vector<16x8xbf16> to vector<1x16x8xbf16>
    tpu.vector_store %arg6[%c0_43, %c0_44, %c32], %94 {strides = array<i32>} : memref<1x16x64xbf16, #tpu.memory_space<vmem>>, vector<1x16x8xbf16>,
    %95 = vector.extract_strided_slice %89 {offsets = [16, 0], sizes = [16, 8], strides = [1, 1]} : vector<32x8xf32> to vector<16x8xf32>
    %96 = arith.truncf %95 : vector<16x8xf32> to vector<16x8xbf16>
    %c0_45 = arith.constant 0 : index
    %c0_46 = arith.constant 0 : index
    %c32_47 = arith.constant 32 : index
    %97 = vector.load %arg5[%c0_45, %c0_46, %c32_47] : memref<1x16x64xbf16, #tpu.memory_space<vmem>>, vector<1x16x8xbf16>
    %98 = vector.shape_cast %97 : vector<1x16x8xbf16> to vector<16x8xbf16>
    %99 = vector.shape_cast %96 : vector<16x8xbf16> to vector<1x16x8xbf16>
    tpu.vector_store %arg5[%c0_45, %c0_46, %c32_47], %99 {strides = array<i32>} : memref<1x16x64xbf16, #tpu.memory_space<vmem>>, vector<1x16x8xbf16>,
    %100 = vector.extract_strided_slice %10 {offsets = [0, 160], sizes = [32, 16], strides = [1, 1]} : vector<32x256xf32> to vector<32x16xf32>
    %101 = vector.extract_strided_slice %10 {offsets = [0, 176], sizes = [32, 16], strides = [1, 1]} : vector<32x256xf32> to vector<32x16xf32>
    %102 = arith.maximumf %100, %101 : vector<32x16xf32>
    %103 = arith.truncf %102 : vector<32x16xf32> to vector<32x16xbf16>
    %cst_48 = arith.constant dense<0.000000e+00> : vector<32x8xf32>
    %104 = tpu.matmul %103, %12, %cst_48 {dimension_numbers = #tpu.dot_dimension_numbers<[1], [0], [0], [1], [0, 0, 1, 1], [], []>} : vector<32x16xbf16>, vector<16x8xbf16>, vector<32x8xf32> -> vector<32x8xf32>
    %cst_49 = arith.constant dense<0.000000e+00> : vector<32x8xf32>
    %105 = tpu.matmul %103, %14, %cst_49 {dimension_numbers = #tpu.dot_dimension_numbers<[1], [0], [0], [1], [0, 0, 1, 1], [], []>} : vector<32x16xbf16>, vector<16x8xbf16>, vector<32x8xf32> -> vector<32x8xf32>
    %106 = arith.maximumf %104, %105 : vector<32x8xf32>
    %107 = vector.extract_strided_slice %106 {offsets = [0, 0], sizes = [16, 8], strides = [1, 1]} : vector<32x8xf32> to vector<16x8xf32>
    %108 = arith.truncf %107 : vector<16x8xf32> to vector<16x8xbf16>
    %c0_50 = arith.constant 0 : index
    %c0_51 = arith.constant 0 : index
    %c40 = arith.constant 40 : index
    %109 = vector.load %arg6[%c0_50, %c0_51, %c40] : memref<1x16x64xbf16, #tpu.memory_space<vmem>>, vector<1x16x8xbf16>
    %110 = vector.shape_cast %109 : vector<1x16x8xbf16> to vector<16x8xbf16>
    %111 = vector.shape_cast %108 : vector<16x8xbf16> to vector<1x16x8xbf16>
    tpu.vector_store %arg6[%c0_50, %c0_51, %c40], %111 {strides = array<i32>} : memref<1x16x64xbf16, #tpu.memory_space<vmem>>, vector<1x16x8xbf16>,
    %112 = vector.extract_strided_slice %106 {offsets = [16, 0], sizes = [16, 8], strides = [1, 1]} : vector<32x8xf32> to vector<16x8xf32>
    %113 = arith.truncf %112 : vector<16x8xf32> to vector<16x8xbf16>
    %c0_52 = arith.constant 0 : index
    %c0_53 = arith.constant 0 : index
    %c40_54 = arith.constant 40 : index
    %114 = vector.load %arg5[%c0_52, %c0_53, %c40_54] : memref<1x16x64xbf16, #tpu.memory_space<vmem>>, vector<1x16x8xbf16>
    %115 = vector.shape_cast %114 : vector<1x16x8xbf16> to vector<16x8xbf16>
    %116 = vector.shape_cast %113 : vector<16x8xbf16> to vector<1x16x8xbf16>
    tpu.vector_store %arg5[%c0_52, %c0_53, %c40_54], %116 {strides = array<i32>} : memref<1x16x64xbf16, #tpu.memory_space<vmem>>, vector<1x16x8xbf16>,
    %117 = vector.extract_strided_slice %10 {offsets = [0, 192], sizes = [32, 16], strides = [1, 1]} : vector<32x256xf32> to vector<32x16xf32>
    %118 = vector.extract_strided_slice %10 {offsets = [0, 208], sizes = [32, 16], strides = [1, 1]} : vector<32x256xf32> to vector<32x16xf32>
    %119 = arith.maximumf %117, %118 : vector<32x16xf32>
    %120 = arith.truncf %119 : vector<32x16xf32> to vector<32x16xbf16>
    %cst_55 = arith.constant dense<0.000000e+00> : vector<32x8xf32>
    %121 = tpu.matmul %120, %12, %cst_55 {dimension_numbers = #tpu.dot_dimension_numbers<[1], [0], [0], [1], [0, 0, 1, 1], [], []>} : vector<32x16xbf16>, vector<16x8xbf16>, vector<32x8xf32> -> vector<32x8xf32>
    %cst_56 = arith.constant dense<0.000000e+00> : vector<32x8xf32>
    %122 = tpu.matmul %120, %14, %cst_56 {dimension_numbers = #tpu.dot_dimension_numbers<[1], [0], [0], [1], [0, 0, 1, 1], [], []>} : vector<32x16xbf16>, vector<16x8xbf16>, vector<32x8xf32> -> vector<32x8xf32>
    %123 = arith.maximumf %121, %122 : vector<32x8xf32>
    %124 = vector.extract_strided_slice %123 {offsets = [0, 0], sizes = [16, 8], strides = [1, 1]} : vector<32x8xf32> to vector<16x8xf32>
    %125 = arith.truncf %124 : vector<16x8xf32> to vector<16x8xbf16>
    %c0_57 = arith.constant 0 : index
    %c0_58 = arith.constant 0 : index
    %c48 = arith.constant 48 : index
    %126 = vector.load %arg6[%c0_57, %c0_58, %c48] : memref<1x16x64xbf16, #tpu.memory_space<vmem>>, vector<1x16x8xbf16>
    %127 = vector.shape_cast %126 : vector<1x16x8xbf16> to vector<16x8xbf16>
    %128 = vector.shape_cast %125 : vector<16x8xbf16> to vector<1x16x8xbf16>
    tpu.vector_store %arg6[%c0_57, %c0_58, %c48], %128 {strides = array<i32>} : memref<1x16x64xbf16, #tpu.memory_space<vmem>>, vector<1x16x8xbf16>,
    %129 = vector.extract_strided_slice %123 {offsets = [16, 0], sizes = [16, 8], strides = [1, 1]} : vector<32x8xf32> to vector<16x8xf32>
    %130 = arith.truncf %129 : vector<16x8xf32> to vector<16x8xbf16>
    %c0_59 = arith.constant 0 : index
    %c0_60 = arith.constant 0 : index
    %c48_61 = arith.constant 48 : index
    %131 = vector.load %arg5[%c0_59, %c0_60, %c48_61] : memref<1x16x64xbf16, #tpu.memory_space<vmem>>, vector<1x16x8xbf16>
    %132 = vector.shape_cast %131 : vector<1x16x8xbf16> to vector<16x8xbf16>
    %133 = vector.shape_cast %130 : vector<16x8xbf16> to vector<1x16x8xbf16>
    tpu.vector_store %arg5[%c0_59, %c0_60, %c48_61], %133 {strides = array<i32>} : memref<1x16x64xbf16, #tpu.memory_space<vmem>>, vector<1x16x8xbf16>,
    %134 = vector.extract_strided_slice %10 {offsets = [0, 224], sizes = [32, 16], strides = [1, 1]} : vector<32x256xf32> to vector<32x16xf32>
    %135 = vector.extract_strided_slice %10 {offsets = [0, 240], sizes = [32, 16], strides = [1, 1]} : vector<32x256xf32> to vector<32x16xf32>
    %136 = arith.maximumf %134, %135 : vector<32x16xf32>
    %137 = arith.truncf %136 : vector<32x16xf32> to vector<32x16xbf16>
    %cst_62 = arith.constant dense<0.000000e+00> : vector<32x8xf32>
    %138 = tpu.matmul %137, %12, %cst_62 {dimension_numbers = #tpu.dot_dimension_numbers<[1], [0], [0], [1], [0, 0, 1, 1], [], []>} : vector<32x16xbf16>, vector<16x8xbf16>, vector<32x8xf32> -> vector<32x8xf32>
    %cst_63 = arith.constant dense<0.000000e+00> : vector<32x8xf32>
    %139 = tpu.matmul %137, %14, %cst_63 {dimension_numbers = #tpu.dot_dimension_numbers<[1], [0], [0], [1], [0, 0, 1, 1], [], []>} : vector<32x16xbf16>, vector<16x8xbf16>, vector<32x8xf32> -> vector<32x8xf32>
    %140 = arith.maximumf %138, %139 : vector<32x8xf32>
    %141 = vector.extract_strided_slice %140 {offsets = [0, 0], sizes = [16, 8], strides = [1, 1]} : vector<32x8xf32> to vector<16x8xf32>
    %142 = arith.truncf %141 : vector<16x8xf32> to vector<16x8xbf16>
    %c0_64 = arith.constant 0 : index
    %c0_65 = arith.constant 0 : index
    %c56 = arith.constant 56 : index
    %143 = vector.load %arg6[%c0_64, %c0_65, %c56] : memref<1x16x64xbf16, #tpu.memory_space<vmem>>, vector<1x16x8xbf16>
    %144 = vector.shape_cast %143 : vector<1x16x8xbf16> to vector<16x8xbf16>
    %145 = vector.shape_cast %142 : vector<16x8xbf16> to vector<1x16x8xbf16>
    tpu.vector_store %arg6[%c0_64, %c0_65, %c56], %145 {strides = array<i32>} : memref<1x16x64xbf16, #tpu.memory_space<vmem>>, vector<1x16x8xbf16>,
    %146 = vector.extract_strided_slice %140 {offsets = [16, 0], sizes = [16, 8], strides = [1, 1]} : vector<32x8xf32> to vector<16x8xf32>
    %147 = arith.truncf %146 : vector<16x8xf32> to vector<16x8xbf16>
    %c0_66 = arith.constant 0 : index
    %c0_67 = arith.constant 0 : index
    %c56_68 = arith.constant 56 : index
    %148 = vector.load %arg5[%c0_66, %c0_67, %c56_68] : memref<1x16x64xbf16, #tpu.memory_space<vmem>>, vector<1x16x8xbf16>
    %149 = vector.shape_cast %148 : vector<1x16x8xbf16> to vector<16x8xbf16>
    %150 = vector.shape_cast %147 : vector<16x8xbf16> to vector<1x16x8xbf16>
    tpu.vector_store %arg5[%c0_66, %c0_67, %c56_68], %150 {strides = array<i32>} : memref<1x16x64xbf16, #tpu.memory_space<vmem>>, vector<1x16x8xbf16>,
    return
  }
  func.func @transform_0(%arg0: i32) -> (i32, i32, i32) {
    %c0_i32 = arith.constant 0 : i32
    %c0_i32_0 = arith.constant 0 : i32
    %c0_i32_1 = arith.constant 0 : i32
    return %arg0, %c0_i32, %c0_i32_0 : i32, i32, i32
  }
  func.func @transform_1(%arg0: i32) -> (i32, i32) {
    %c0_i32 = arith.constant 0 : i32
    %c0_i32_0 = arith.constant 0 : i32
    %c0_i32_1 = arith.constant 0 : i32
    return %c0_i32, %c0_i32_0 : i32, i32
  }
  func.func @transform_2(%arg0: i32) -> (i32, i32, i32) {
    %c0_i32 = arith.constant 0 : i32
    %c0_i32_0 = arith.constant 0 : i32
    %c0_i32_1 = arith.constant 0 : i32
    %c0_i32_2 = arith.constant 0 : i32
    return %c0_i32, %c0_i32_0, %c0_i32_1 : i32, i32, i32
  }
  func.func @transform_3(%arg0: i32) -> (i32, i32, i32) {
    %c0_i32 = arith.constant 0 : i32
    %c0_i32_0 = arith.constant 0 : i32
    %c0_i32_1 = arith.constant 0 : i32
    return %arg0, %c0_i32, %c0_i32_0 : i32, i32, i32
  }
  func.func @transform_4(%arg0: i32) -> (i32, i32, i32) {
    %c0_i32 = arith.constant 0 : i32
    %c0_i32_0 = arith.constant 0 : i32
    %c0_i32_1 = arith.constant 0 : i32
    return %arg0, %c0_i32, %c0_i32_0 : i32, i32, i32
  }
  func.func @transform_5(%arg0: i32) -> (i32, i32, i32) {
    %c0_i32 = arith.constant 0 : i32
    %c0_i32_0 = arith.constant 0 : i32
    %c0_i32_1 = arith.constant 0 : i32
    return %arg0, %c0_i32, %c0_i32_0 : i32, i32, i32
  }
}

</mosaic_0001>

<bundles_post_ra>
// kernel: tpu_custom_call.1
= control target key start
LH: loop header
LB: loop body
LE: loop exit
PB: predicated region body
PF: predicated region fallthrough
CT: control target
= control target key end

     0   :  { %11 = vsyncpa [#allocation3], 0  ;;  %s2740_s0 = inlined_call_operand.hbm [shape: f32[2,32,256], index: 0, kind: input, shape index: {}]   ;;  %s2741_s1 = inlined_call_operand.vmem [shape: bf16[48,32], index: 1, kind: input, shape index: {}]   ;;  %s2742_s2 = inlined_call_operand.vmem [shape: bf16[2,16,8], index: 2, kind: input, shape index: {}]   ;;  %s2743_s3 = inlined_call_operand.hbm [shape: bf16[2,16,256], index: 3, kind: output, shape index: {0}]   ;;  %s2744_s4 = inlined_call_operand.hbm [shape: bf16[2,16,64], index: 4, kind: output, shape index: {1}]   ;;  %s2745_s5 = inlined_call_operand.hbm [shape: bf16[2,16,64], index: 5, kind: output, shape index: {2}]  }
   0x1   :  { %13 = vsyncpa [#allocation3 + $0x1], 0 }
   0x2   :  { %14 = vsyncpa [#allocation4], 0 }
   0x3   :  { %16 = vsyncpa [#allocation4 + $0x1], 0 }
   0x4   :  { %17 = vsyncpa [#allocation7], 0 }
   0x5   :  { %19 = vsyncpa [#allocation7 + $0x1], 0  ;;  %s2333_s18 = smov 0   ;;  %s2335_s19 = smov 0  }
   0x6   :  { %s2337_s20 = smov 0   ;;  %s2339_s21 = smov 0  }
   0x7 LB: > { %s2354_s22 = sadd.s32 4294967295, %s2282_s21   ;;  %s2747_s23 = sadd.s32 4294967294, %s2282_s21   ;;  %s2282_s21 = sphi %s2339_s21, %s2763_s21   ;;  %s2278_s20 = sphi %s2337_s20, %s2762_s20   ;;  %s2274_s19 = sphi %s2335_s19, %s2761_s19   ;;  %s2270_s18 = sphi %s2333_s18, %s2760_s18  }
   0x8   : > { %s2358_s24 = sadd.s32 1, %s2282_s21   ;;  %s32_s25 = sadd.s32 1, %s2278_s20 }
   0x9   : > { %s29_s26 = ssub.s32 %s2282_s21, %s2358_s24  ;;  %p39_p0 = scmp.ne.s32.totalorder %s2278_s20, %s2274_s19 }
   0xa   : > { %p30_p1 = scmp.eq.s32.totalorder %s29_s26, 0  ;;  %p40_p2 = scmp.eq.s32.totalorder %s2282_s21, 0 }
   0xb   : > { %p45_p3 = scmp.ne.s32.totalorder %s2274_s19, %s2270_s18  ;;  %p46_p4 = scmp.eq.s32.totalorder %s2354_s22, 0 }
   0xc   : > { %s2370_s27 = scalar_select %p30_p1, %s2278_s20, %s32_s25  }
   0xd   : > { %p2372_p5 = por %p40_p2, %p39_p0  ;;  %p2376_p6 = por %p46_p4, %p45_p3 }
   0xe   : > { %p111_p7 = scmp.eq.s32.totalorder %s2354_s22, 1  ;;  %p117_p8 = scmp.eq.s32.totalorder %s2747_s23, 1 }
   0xf   : > { %p2052_p10 = scmp.lt.s32.totalorder %s2282_s21, 2  ;;  %s195_s7 = sand.u32 1, %s2278_s20  }
  0x10   : > { %p2385_p11 = por %p111_p7, %p39_p0  ;;  %p2389_p12 = por %p117_p8, %p45_p3 }
  0x11   : > { %s1848_s8 = sshll.u32 %s2282_s21, 10  ;;  %s1753_s9 = sshll.u32 %s195_s7, 6 }
  0x12   : > { %s2752_s30 = scalar_select %p2385_p11, 1, 0 }
  0x13   : > { %s2753_s6 = scalar_select %p2389_p12, 1, 0 }
  0x14   : > { %s2398_s12 = scalar_lea.hbm %s2740_s0, %s1848_s8  ;;  %s199_s13 = scalar_lea.vmem [#allocation2], %s1753_s9 }
  0x15   : > { %s206_s14 = sshll.u32 %s199_s13, 4  ;;  %p2402_p13 = pnand %p2052_p10, %p2372_p5  ;;  %s2406_s14 = int_to_ptr.vmem [resolvable:$true] %s206_s14 }
  0x16   : > { %s2408_s16 = scalar_lea.sflag [#allocation3], %s195_s7  ;;  %s2126_s17 = scalar_lea.hbm %s2398_s12, 1024 }
  0x17   : > { %p2127_p0 = scmp.ne.s32.totalorder %s2398_s12, %s2126_s17  ;;  %p2128_p1 = pneg %p2402_p13 }
  0x18   : > { %s2131_s28 = scalar_lea.hbm %s2740_s0, 2048  ;;  %p2132_p4 = scmp.lt.u32.totalorder %s2398_s12, %s2740_s0 }
  0x19   : > { %p2129_p2 = pnand %p2128_p1, %p2127_p0  ;;  %p2133_p5 = scmp.lt.u32.totalorder %s2131_s28, %s2126_s17 }
  0x1a   : > { %p2135_p8 = scmp.lt.u32.totalorder %s2126_s17, %s2398_s12 }
  0x1b   : > { %p2130_p3 = pneg %p2129_p2  ;;  %p2134_p7 = por %p2133_p5, %p2132_p4 }
  0x1d   : > { %p2136_p10 = por %p2135_p8, %p2134_p7 }
  0x1f   : > { %p2137_p9 = pnand %p2136_p10, %p2130_p3 }
  0x21   : > { %2140 = shalt.err (!%p2137_p9)
}
  0x22   : > { %s2141_s7 = scalar_lea.vmem %s2406_s14, 1024  ;;  %s2284_s10 = smov [#allocation2]  }
  0x23   : > { %p2142_p0 = scmp.ne.s32.totalorder %s2406_s14, %s2141_s7  ;;  %s2146_s11 = sshll.u32 %s2284_s10, 4  ;;  %s2147_s11 = int_to_ptr.vmem [resolvable:$false] %s2146_s11 }
  0x24   : > { %s2148_s13 = scalar_lea.vmem %s2147_s11, 2048  ;;  %p2149_p11 = scmp.lt.s32.totalorder %s2406_s14, %s2147_s11 }
  0x25   : > { %p2144_p2 = pnand %p2142_p0, %p2128_p1  ;;  %p2150_p4 = scmp.lt.s32.totalorder %s2148_s13, %s2141_s7 }
  0x27   : > { %p2145_p12 = pneg %p2144_p2  ;;  %p2151_p5 = por %p2150_p4, %p2149_p11 }
  0x29   : > { %p2152_p7 = pnand %p2151_p5, %p2145_p12 }
  0x2b   : > { %2155 = shalt.err (!%p2152_p7)
}
  0x2c   : > { %s2285_s17 = smov 256   ;;  %s2286_s25 = smov 16  }
  0x2d   : > { %2041 = dma.hbm_to_vmem [thread:$0]  (!%p2402_p13), %s2398_s12, 1024, %s2406_s14, %s2408_s16, %s2285_s17, %s2285_s17, %s2286_s25  }
  0x2e   : > { %p1756_p9 = scmp.ge.s32.totalorder %s2282_s21, 1  ;;  %p214_p1 = scmp.lt.s32.totalorder %s2282_s21, 3 }
  0x30   : > { %p215_p3 = pnand %p1756_p9, %p214_p1 }
  0x31   : > { %s2439_s26 = sand.u32 (!%p215_p3), 1, %s2274_s19  }
  0x32   : > { %218 = sbr.rel (%p215_p3) target bundleno = 970 (0x3ca), region = 32  ;;  %s1757_s28 = sshll.u32 (!%p215_p3), %s2439_s26, 6 }
  0x33   : > { %s221_s8 = scalar_lea.sflag (!%p215_p3), [#allocation3], %s2439_s26  ;;  %s224_s9 = scalar_lea.vmem (!%p215_p3), [#allocation2], %s1757_s28 }
  0x39   : > { %2257 = dma.done.wait (%p2376_p6), %s221_s8, 1024  }
  0x3a   : > { %2259 = vsyncadd (%p2376_p6), %s221_s8, 4294966272  ;;  %v2287_v0 = vmov 0   ;;  %v269_v1 = vld [vmem:[%s224_s9 + $0x8] sm:$0xff]  ;;  %v271_v2 = vld [vmem:[%s224_s9 + $0x18] sm:$0xff]  ;;  %vm295_vm0 = vcmask 261120   ;;  %s2288_s10 = smov 112  }
  0x3b   : > { %337 = vmatprep.mubr.bf16.mxu0 %v2287_v0  ;;  %v268_v3 = vld [vmem:[%s224_s9] sm:$0xff]  ;;  %v277_v4 = vpack.c.bf16 %v271_v2, %v269_v1  ;;  %v270_v5 = vld [vmem:[%s224_s9 + $0x10] sm:$0xff]  ;;  %v273_v6 = vld [vmem:[%s224_s9 + $0x28] sm:$0xff]  ;;  %vm415_vm1 = vcmask 130048   ;;  %s2289_s28 = smov 96   ;;  %s2748_s8 = smov 64  }
  0x3c   : > { %v275_v7 = vld [vmem:[%s224_s9 + $0x38] sm:$0xff]  ;;  %v276_v8 = vpack.c.bf16 %v270_v5, %v268_v3  ;;  %v272_v10 = vld [vmem:[%s224_s9 + $0x20] sm:$0xff]  ;;  %v274_v11 = vld [vmem:[%s224_s9 + $0x30] sm:$0xff]  ;;  %s2291_s9 = smov 32   ;;  %s1758_s12 = sshll.u32 %s2439_s26, 4  ;;  %vm538_vm2 = vcmask 60416  }
  0x3d   : > { %v279_v9 = vpack.c.bf16 %v275_v7, %v273_v6  ;;  %305 = vmatprep.subr.bf16.mxu0 %v277_v4  ;;  %v278_v12 = vpack.c.bf16 %v274_v11, %v272_v10  ;;  %v2121_v13 = vld [vmem:[%s2741_s1] sm:$0xff]   ;;  %v2122_v14 = vld [vmem:[%s2741_s1 + $0x8] sm:$0xff]   ;;  %v2125_v29 = vld [vmem:[%s2741_s1 + $0x10] sm:$0xff]   ;;  %s2553_s29 = scalar_lea.vmem [#allocation5], %s1758_s12  ;;  %s1759_s14 = sshll.u32 %s2439_s26, 3 }
  0x3e   : > { %306 = vmatpush1.bf16.msra.mxu0 %v276_v8  ;;  %v2458_v16 = vld [vmem:[%s2742_s2] sm:$0xff]   ;;  %v2468_v22 = vld [vmem:[%s2742_s2 + $0x8] sm:$0xff]   ;;  %s2558_s15 = scalar_lea.vmem [#allocation6], %s1759_s14  ;;  %s2561_s16 = scalar_lea.vmem [#allocation8], %s1759_s14 }
  0x3f   : > { %307 = vmatprep.subr.bf16.mxu0 %v279_v9  ;;  %1934 = vmatprep.subr.bf16.mxu1 %v2458_v16  ;;  %s2292_s7 = smov 8   ;;  %s2294_s11 = smov 24  }
  0x40   : > { %1935 = vmatpush3.bf16.msra.mxu1 %v2458_v16  ;;  %s2295_s13 = smov 40   ;;  %s1584_s17 = sshll.u32 %s2553_s29, 4  ;;  %s2576_s17 = int_to_ptr.vmem [resolvable:$true] %s1584_s17 }
  0x41   : > { %1940 = vmatprep.subr.bf16.mxu1 %v2468_v22  ;;  %s2296_s25 = smov 48   ;;  %s1561_s14 = scalar_lea.sflag [#allocation4], %s2439_s26 }
  0x42   : > { %308 = vmatpush1.bf16.msra.mxu0 %v278_v12  ;;  %p2755_p11 = scmp.ne.s32.totalorder %s2752_s30, 0 }
  0x43   : > { %1958 = vmatprep.subr.bf16.mxu0 %v2458_v16 }
  0x45   : > { %1764 = vmatmul.mubr.msk.bf16.vlgmr.msra.gmra.mrb[0].mxu0 %vm295_vm0, %v2121_v13 }
  0x46   : > { %347 = vmatprep.mubr.bf16.mxu0 %v2287_v0  ;;  %1959 = vmatpush3.bf16.msra.mxu0 %v2458_v16 }
  0x47   : > { %1970 = vmatprep.subr.bf16.mxu0 %v2458_v16 }
  0x4d   : > { %1765 = vmatmul.mubr.msk.bf16.gmra.mrb[4].mxu0 %vm295_vm0, %v2122_v14 }
  0x4e   : > { %357 = vmatprep.mubr.bf16.mxu0 %v2287_v0 }
  0x55   : > { %1766 = vmatmul.mubr.msk.bf16.gmra.mrb[8].mxu0 %vm295_vm0, %v2125_v29 }
 0x118   : > { %v339_v15 = vpop.f32.mrb[0].mxu0 }
 0x119   : > { %v341_v17 = vpop.f32.mrb[1].mxu0 }
 0x11a   : > { %v343_v18 = vpop.f32.mrb[2].mxu0 }
 0x11b   : > { %v345_v19 = vpop.f32.mrb[3].mxu0  ;;  %v2101_v20 = vpack.i.bf16 %v343_v18, %v339_v15 }
 0x11c   : > { %v2111_v21 = vpack.i.bf16 %v345_v19, %v341_v17 }
 0x11d   : > { %2102 = vrot.lane.b32.xlu0 %v2101_v20, %s2288_s10 }
 0x11e   : > { %2112 = vrot.lane.b32.xlu1 %v2111_v21, %s2288_s10 }
 0x120   : > { %v349_v23 = vpop.f32.mrb[4].mxu0 }
 0x121   : > { %v351_v24 = vpop.f32.mrb[5].mxu0 }
 0x122   : > { %v353_v25 = vpop.f32.mrb[6].mxu0 }
 0x123   : > { %v2106_v26 = vpack.i.bf16 %v353_v25, %v349_v23  ;;  %v355_v27 = vpop.f32.mrb[7].mxu0 }
 0x124   : > { %v2116_v28 = vpack.i.bf16 %v355_v27, %v351_v24 }
 0x125   : > { %2107 = vrot.lane.b32.xlu0 %v2106_v26, %s2288_s10 }
 0x126   : > { %2117 = vrot.lane.b32.xlu1 %v2116_v28, %s2288_s10  ;;  %s2293_s10 = smov 16  }
 0x128   : > { %v359_v2 = vpop.f32.mrb[8].mxu0 }
 0x129   : > { %v361_v3 = vpop.f32.mrb[9].mxu0 }
 0x12a   : > { %v1849_v4 = vpack.c.bf16 %v361_v3, %v359_v2  ;;  %v363_v5 = vpop.f32.mrb[10].mxu0 }
 0x12b   : > { %v365_v6 = vpop.f32.mrb[11].mxu0 }
 0x12c   : > { %380 = vst [vmem:[%s2553_s29] sm:$0xff] %v1849_v4  ;;  %v1850_v7 = vpack.c.bf16 %v365_v6, %v363_v5 }
 0x12e   : > { %381 = vst [vmem:[%s2553_s29 + $0x8] sm:$0xff] %v1850_v7 }
 0x18f   : > { %v2103_v30 = vpop.permute.xlu0 %2102 }
 0x190   : > { %v2105_v31 = vunpack.i.h.bf16 %v2103_v30  ;;  %v2104_v32 = vunpack.i.l.bf16 %v2103_v30  ;;  %v2113_v33 = vpop.permute.xlu1 %2112 }
 0x191   : > { %v2115_v34 = vunpack.i.h.bf16 %v2113_v33  ;;  %v2114_v35 = vunpack.i.l.bf16 %v2113_v33 }
 0x192   : > { %v404_v36 = vmax.f32 %v343_v18, %v2105_v31  ;;  %v403_v37 = vmax.f32 %v339_v15, %v2104_v32 }
 0x193   : > { %v993_v38 = vmax.f32 %v345_v19, %v2115_v34  ;;  %v992_v39 = vmax.f32 %v341_v17, %v2114_v35 }
 0x194   : > { %v407_v40 = vpack.c.bf16 %v404_v36, %v403_v37 }
 0x195   : > { %v2475_v41 = vpack.c.bf16 %v993_v38, %v992_v39 }
 0x196   : > { %1936 = vmatprep.mubr.msk.bf16.mxu1 %vm415_vm1, %v407_v40  ;;  %553 = vrot.lane.b32.xlu0 %v407_v40, %s2289_s28 }
 0x197   : > { %v2108_v42 = vpop.permute.xlu0 %2107 }
 0x198   : > { %v2110_v43 = vunpack.i.h.bf16 %v2108_v42  ;;  %v2109_v44 = vunpack.i.l.bf16 %v2108_v42  ;;  %v2118_v45 = vpop.permute.xlu1 %2117 }
 0x199   : > { %v2120_v46 = vunpack.i.h.bf16 %v2118_v45  ;;  %v2119_v47 = vunpack.i.l.bf16 %v2118_v45 }
 0x19a   : > { %v406_v48 = vmax.f32 %v353_v25, %v2110_v43  ;;  %v405_v49 = vmax.f32 %v349_v23, %v2109_v44  ;;  %694 = vrot.lane.b32.xlu0 %v407_v40, %s2748_s8 }
 0x19b   : > { %v995_v50 = vmax.f32 %v355_v27, %v2120_v46  ;;  %v994_v51 = vmax.f32 %v351_v24, %v2119_v47 }
 0x19c   : > { %v408_v52 = vpack.c.bf16 %v406_v48, %v405_v49 }
 0x19d   : > { %v997_v53 = vpack.c.bf16 %v995_v50, %v994_v51 }
 0x19e   : > { %835 = vrot.lane.b32.xlu0 %v407_v40, %s2291_s9  ;;  %1937 = vmatmul.mubr.msk.bf16.vlgmr.msra.gmra.mrb[0].mxu1 %vm415_vm1, %v408_v52 }
 0x19f   : > { %555 = vrot.lane.b32.xlu1 %v408_v52, %s2289_s28  ;;  %1942 = vmatprep.mubr.msk.bf16.mxu1 %vm415_vm1, %v407_v40 }
 0x1a0   : > { %1941 = vmatpush3.bf16.msra.mxu1 %v2468_v22 }
 0x1a1   : > { %1946 = vmatprep.subr.bf16.mxu1 %v2458_v16 }
 0x1a2   : > { %1137 = vrot.lane.b32.xlu0 %v2475_v41, %s2289_s28 }
 0x1a3   : > { %696 = vrot.lane.b32.xlu1 %v408_v52, %s2748_s8 }
 0x1a6   : > { %1278 = vrot.lane.b32.xlu0 %v2475_v41, %s2748_s8  ;;  %1943 = vmatmul.mubr.msk.bf16.vlgmr.msra.gmra.mrb[4].mxu1 %vm415_vm1, %v408_v52 }
 0x1a7   : > { %837 = vrot.lane.b32.xlu1 %v408_v52, %s2291_s9  ;;  %1947 = vmatpush3.bf16.msra.mxu1 %v2458_v16 }
 0x1a8   : > { %1952 = vmatprep.subr.bf16.mxu1 %v2468_v22 }
 0x1aa   : > { %1419 = vrot.lane.b32.xlu0 %v2475_v41, %s2291_s9 }
 0x1ab   : > { %1139 = vrot.lane.b32.xlu1 %v997_v53, %s2289_s28  ;;  %s1883_s28 = sshll.u32 %s2354_s22, 8 }
 0x1ac   : > { %s2584_s29 = scalar_lea.hbm %s2743_s3, %s1883_s28 }
 0x1af   : > { %1280 = vrot.lane.b32.xlu1 %v997_v53, %s2748_s8 }
 0x1b3   : > { %1421 = vrot.lane.b32.xlu1 %v997_v53, %s2291_s9 }
 0x208   : > { %v554_v54 = vpop.permute.xlu0 %553 }
 0x209   : > { %1948 = vmatprep.mubr.msk.bf16.mxu1 %vm415_vm1, %v554_v54 }
 0x20c   : > { %v695_v55 = vpop.permute.xlu0 %694 }
 0x20d   : > { %1960 = vmatprep.mubr.msk.bf16.mxu0 %vm415_vm1, %v695_v55 }
 0x210   : > { %v836_v58 = vpop.permute.xlu0 %835 }
 0x211   : > { %v556_v56 = vpop.permute.xlu1 %555 }
 0x212   : > { %1949 = vmatmul.mubr.msk.bf16.vlgmr.msra.gmra.mrb[8].mxu1 %vm415_vm1, %v556_v56 }
 0x213   : > { %1953 = vmatpush3.bf16.msra.mxu1 %v2468_v22  ;;  %1954 = vmatprep.mubr.msk.bf16.mxu1 %vm415_vm1, %v554_v54 }
 0x214   : > { %1964 = vmatprep.subr.bf16.mxu1 %v2468_v22  ;;  %v1138_v60 = vpop.permute.xlu0 %1137 }
 0x215   : > { %v697_v57 = vpop.permute.xlu1 %696 }
 0x216   : > { %1961 = vmatmul.mubr.msk.bf16.vlgmr.msra.gmra.mrb[12].mxu0 %vm415_vm1, %v697_v57 }
 0x217   : > { %1972 = vmatprep.mubr.msk.bf16.mxu0 %vm415_vm1, %v836_v58  ;;  %1971 = vmatpush3.bf16.msra.mxu0 %v2458_v16 }
 0x218   : > { %1982 = vmatprep.subr.bf16.mxu0 %v2458_v16  ;;  %v1279_v62 = vpop.permute.xlu0 %1278 }
 0x219   : > { %v838_v59 = vpop.permute.xlu1 %837 }
 0x21a   : > { %1955 = vmatmul.mubr.msk.bf16.vlgmr.msra.gmra.mrb[12].mxu1 %vm415_vm1, %v556_v56 }
 0x21b   : > { %1965 = vmatpush3.bf16.msra.mxu1 %v2468_v22  ;;  %1966 = vmatprep.mubr.msk.bf16.mxu1 %vm415_vm1, %v695_v55 }
 0x21c   : > { %1976 = vmatprep.subr.bf16.mxu1 %v2468_v22  ;;  %v1420_v0 = vpop.permute.xlu0 %1419 }
 0x21d   : > { %v1140_v61 = vpop.permute.xlu1 %1139 }
 0x21e   : > { %1973 = vmatmul.mubr.msk.bf16.vlgmr.msra.gmra.mrb[16].mxu0 %vm415_vm1, %v838_v59 }
 0x21f   : > { %1984 = vmatprep.mubr.msk.bf16.mxu0 %vm415_vm1, %v2475_v41  ;;  %1983 = vmatpush3.bf16.msra.mxu0 %v2458_v16 }
 0x220   : > { %1994 = vmatprep.subr.bf16.mxu0 %v2458_v16 }
 0x221   : > { %v1281_v63 = vpop.permute.xlu1 %1280 }
 0x222   : > { %1967 = vmatmul.mubr.msk.bf16.vlgmr.msra.gmra.mrb[16].mxu1 %vm415_vm1, %v697_v57 }
 0x223   : > { %1977 = vmatpush3.bf16.msra.mxu1 %v2468_v22  ;;  %1978 = vmatprep.mubr.msk.bf16.mxu1 %vm415_vm1, %v836_v58 }
 0x224   : > { %1988 = vmatprep.subr.bf16.mxu1 %v2468_v22 }
 0x225   : > { %v1422_v1 = vpop.permute.xlu1 %1421 }
 0x226   : > { %1985 = vmatmul.mubr.msk.bf16.vlgmr.msra.gmra.mrb[20].mxu0 %vm415_vm1, %v997_v53 }
 0x227   : > { %1996 = vmatprep.mubr.msk.bf16.mxu0 %vm415_vm1, %v1138_v60  ;;  %1995 = vmatpush3.bf16.msra.mxu0 %v2458_v16 }
 0x228   : > { %2006 = vmatprep.subr.bf16.mxu0 %v2458_v16 }
 0x22a   : > { %1979 = vmatmul.mubr.msk.bf16.vlgmr.msra.gmra.mrb[20].mxu1 %vm415_vm1, %v838_v59 }
 0x22b   : > { %1989 = vmatpush3.bf16.msra.mxu1 %v2468_v22  ;;  %1990 = vmatprep.mubr.msk.bf16.mxu1 %vm415_vm1, %v2475_v41 }
 0x22c   : > { %2000 = vmatprep.subr.bf16.mxu1 %v2468_v22 }
 0x22e   : > { %1997 = vmatmul.mubr.msk.bf16.vlgmr.msra.gmra.mrb[24].mxu0 %vm415_vm1, %v1140_v61 }
 0x22f   : > { %2008 = vmatprep.mubr.msk.bf16.mxu0 %vm415_vm1, %v1279_v62  ;;  %2007 = vmatpush3.bf16.msra.mxu0 %v2458_v16 }
 0x230   : > { %2018 = vmatprep.subr.bf16.mxu0 %v2458_v16 }
 0x232   : > { %1991 = vmatmul.mubr.msk.bf16.vlgmr.msra.gmra.mrb[24].mxu1 %vm415_vm1, %v997_v53 }
 0x233   : > { %2001 = vmatpush3.bf16.msra.mxu1 %v2468_v22  ;;  %2002 = vmatprep.mubr.msk.bf16.mxu1 %vm415_vm1, %v1138_v60 }
 0x234   : > { %2012 = vmatprep.subr.bf16.mxu1 %v2468_v22 }
 0x236   : > { %2009 = vmatmul.mubr.msk.bf16.vlgmr.msra.gmra.mrb[28].mxu0 %vm415_vm1, %v1281_v63 }
 0x237   : > { %2020 = vmatprep.mubr.msk.bf16.mxu0 %vm415_vm1, %v1420_v0  ;;  %2019 = vmatpush3.bf16.msra.mxu0 %v2458_v16 }
 0x23a   : > { %2003 = vmatmul.mubr.msk.bf16.vlgmr.msra.gmra.mrb[28].mxu1 %vm415_vm1, %v1140_v61 }
 0x23b   : > { %2013 = vmatpush3.bf16.msra.mxu1 %v2468_v22  ;;  %2014 = vmatprep.mubr.msk.bf16.mxu1 %vm415_vm1, %v1279_v62 }
 0x23c   : > { %2024 = vmatprep.subr.bf16.mxu1 %v2468_v22 }
 0x23e   : > { %2021 = vmatmul.mubr.msk.bf16.vlgmr.msra.gmra.mrb[32].mxu0 %vm415_vm1, %v1422_v1 }
 0x242   : > { %2015 = vmatmul.mubr.msk.bf16.vlgmr.msra.gmra.mrb[32].mxu1 %vm415_vm1, %v1281_v63 }
 0x243   : > { %2025 = vmatpush3.bf16.msra.mxu1 %v2468_v22  ;;  %2026 = vmatprep.mubr.msk.bf16.mxu1 %vm415_vm1, %v1420_v0 }
 0x24a   : > { %2027 = vmatmul.mubr.msk.bf16.vlgmr.msra.gmra.mrb[36].mxu1 %vm415_vm1, %v1422_v1 }
 0x271   : > { %v1938_v8 = vpop.f32.mrb[0].mxu1 }
 0x272   : > { %v456_v9 = vpop.f32.mrb[1].mxu1 }
 0x273   : > { %v1939_v10 = vpop.f32.mrb[2].mxu1 }
 0x274   : > { %v459_v11 = vpop.f32.mrb[3].mxu1 }
 0x279   : > { %v1944_v12 = vpop.f32.mrb[4].mxu1 }
 0x27a   : > { %v528_v13 = vmax.f32 %v1938_v8, %v1944_v12  ;;  %v511_v14 = vpop.f32.mrb[5].mxu1 }
 0x27b   : > { %v526_v15 = vmax.f32 %v456_v9, %v511_v14  ;;  %v1945_v16 = vpop.f32.mrb[6].mxu1 }
 0x27c   : > { %v1853_v17 = vpack.c.bf16 %v528_v13, %v528_v13  ;;  %v529_v18 = vmax.f32 %v1939_v10, %v1945_v16  ;;  %v514_v19 = vpop.f32.mrb[7].mxu1 }
 0x27d   : > { %v1851_v20 = vpack.c.bf16 %v526_v15, %v526_v15  ;;  %v527_v21 = vmax.f32 %v459_v11, %v514_v19 }
 0x27e   : > { %549 = vst.msk [vmem:[%s2558_s15] sm:$0xf] %vm538_vm2, %v1853_v17  ;;  %v1854_v22 = vpack.c.bf16 %v529_v18, %v529_v18 }
 0x27f   : > { %539 = vst.msk [vmem:[%s2561_s16] sm:$0xf] %vm538_vm2, %v1851_v20  ;;  %v1852_v23 = vpack.c.bf16 %v527_v21, %v527_v21 }
 0x280   : > { %550 = vst.msk [vmem:[%s2558_s15 + $0x4] sm:$0xf] %vm538_vm2, %v1854_v22 }
 0x281   : > { %540 = vst.msk [vmem:[%s2561_s16 + $0x4] sm:$0xf] %vm538_vm2, %v1852_v23 }
 0x2e5   : > { %v1950_v24 = vpop.f32.mrb[8].mxu1 }
 0x2e6   : > { %v597_v25 = vpop.f32.mrb[9].mxu1 }
 0x2e7   : > { %v1951_v26 = vpop.f32.mrb[10].mxu1 }
 0x2e8   : > { %v600_v27 = vpop.f32.mrb[11].mxu1 }
 0x2e9   : > { %v1962_v28 = vpop.f32.mrb[12].mxu0 }
 0x2ea   : > { %v738_v29 = vpop.f32.mrb[13].mxu0 }
 0x2eb   : > { %v1963_v30 = vpop.f32.mrb[14].mxu0 }
 0x2ec   : > { %v741_v31 = vpop.f32.mrb[15].mxu0 }
 0x2ed   : > { %v1956_v32 = vpop.f32.mrb[12].mxu1 }
 0x2ee   : > { %v663_v33 = vmax.f32 %v1950_v24, %v1956_v32  ;;  %v646_v34 = vpop.f32.mrb[13].mxu1 }
 0x2ef   : > { %v661_v35 = vmax.f32 %v597_v25, %v646_v34  ;;  %v1957_v36 = vpop.f32.mrb[14].mxu1 }
 0x2f0   : > { %v1857_v37 = vpack.c.bf16 %v663_v33, %v663_v33  ;;  %v664_v38 = vmax.f32 %v1951_v26, %v1957_v36  ;;  %v649_v39 = vpop.f32.mrb[15].mxu1 }
 0x2f1   : > { %v662_v40 = vmax.f32 %v600_v27, %v649_v39  ;;  %v1974_v41 = vpop.f32.mrb[16].mxu0  ;;  %v1855_v45 = vpack.c.bf16 %v661_v35, %v661_v35 }
 0x2f2   : > { %v1858_v42 = vpack.c.bf16 %v664_v38, %v664_v38  ;;  %686 = vrot.lane.b32.xlu0 %v1857_v37, %s2292_s7  ;;  %v879_v43 = vpop.f32.mrb[17].mxu0 }
 0x2f3   : > { %v1975_v44 = vpop.f32.mrb[18].mxu0  ;;  %v1856_v48 = vpack.c.bf16 %v662_v40, %v662_v40 }
 0x2f4   : > { %688 = vrot.lane.b32.xlu1 %v1858_v42, %s2292_s7  ;;  %v882_v46 = vpop.f32.mrb[19].mxu0 }
 0x2f5   : > { %v1968_v47 = vpop.f32.mrb[16].mxu1 }
 0x2f6   : > { %v804_v49 = vmax.f32 %v1962_v28, %v1968_v47  ;;  %671 = vrot.lane.b32.xlu0 %v1855_v45, %s2292_s7  ;;  %v787_v50 = vpop.f32.mrb[17].mxu1 }
 0x2f7   : > { %v802_v51 = vmax.f32 %v738_v29, %v787_v50  ;;  %v1969_v52 = vpop.f32.mrb[18].mxu1 }
 0x2f8   : > { %v1861_v53 = vpack.c.bf16 %v804_v49, %v804_v49  ;;  %v805_v54 = vmax.f32 %v1963_v30, %v1969_v52  ;;  %v790_v55 = vpop.f32.mrb[19].mxu1  ;;  %673 = vrot.lane.b32.xlu1 %v1856_v48, %s2292_s7 }
 0x2f9   : > { %v803_v56 = vmax.f32 %v741_v31, %v790_v55  ;;  %v1986_v57 = vpop.f32.mrb[20].mxu0  ;;  %v1859_v61 = vpack.c.bf16 %v802_v51, %v802_v51 }
 0x2fa   : > { %v1862_v58 = vpack.c.bf16 %v805_v54, %v805_v54  ;;  %827 = vrot.lane.b32.xlu0 %v1861_v53, %s2293_s10  ;;  %v1038_v59 = vpop.f32.mrb[21].mxu0 }
 0x2fb   : > { %v1987_v60 = vpop.f32.mrb[22].mxu0  ;;  %v1860_v0 = vpack.c.bf16 %v803_v56, %v803_v56 }
 0x2fc   : > { %829 = vrot.lane.b32.xlu1 %v1862_v58, %s2293_s10  ;;  %v1041_v62 = vpop.f32.mrb[23].mxu0 }
 0x2fd   : > { %v1980_v63 = vpop.f32.mrb[20].mxu1 }
 0x2fe   : > { %v945_v1 = vmax.f32 %v1974_v41, %v1980_v63  ;;  %v928_v2 = vpop.f32.mrb[21].mxu1  ;;  %812 = vrot.lane.b32.xlu0 %v1859_v61, %s2293_s10 }
 0x2ff   : > { %v943_v3 = vmax.f32 %v879_v43, %v928_v2  ;;  %v1981_v4 = vpop.f32.mrb[22].mxu1 }
 0x300   : > { %v1865_v5 = vpack.c.bf16 %v945_v1, %v945_v1  ;;  %v946_v6 = vmax.f32 %v1975_v44, %v1981_v4  ;;  %v931_v7 = vpop.f32.mrb[23].mxu1  ;;  %814 = vrot.lane.b32.xlu1 %v1860_v0, %s2293_s10  ;;  %s2156_s10 = scalar_lea.vmem %s2576_s17, 256 }
 0x301   : > { %v944_v8 = vmax.f32 %v882_v46, %v931_v7  ;;  %v1998_v9 = vpop.f32.mrb[24].mxu0  ;;  %v1863_v13 = vpack.c.bf16 %v943_v3, %v943_v3  ;;  %p2157_p6 = scmp.ne.s32.totalorder %s2576_s17, %s2156_s10 }
 0x302   : > { %v1866_v10 = vpack.c.bf16 %v946_v6, %v946_v6  ;;  %968 = vrot.lane.b32.xlu0 %v1865_v5, %s2294_s11  ;;  %v1181_v11 = vpop.f32.mrb[25].mxu0 }
 0x303   : > { %v1999_v12 = vpop.f32.mrb[26].mxu0  ;;  %v1864_v16 = vpack.c.bf16 %v944_v8, %v944_v8  ;;  %p2158_p12 = pnand %p2157_p6, %p2755_p11 }
 0x304   : > { %v1184_v14 = vpop.f32.mrb[27].mxu0  ;;  %970 = vrot.lane.b32.xlu1 %v1866_v10, %s2294_s11 }
 0x305   : > { %v1992_v15 = vpop.f32.mrb[24].mxu1  ;;  %p2159_p13 = pneg %p2158_p12 }
 0x306   : > { %v1104_v17 = vmax.f32 %v1986_v57, %v1992_v15  ;;  %v1087_v18 = vpop.f32.mrb[25].mxu1  ;;  %953 = vrot.lane.b32.xlu0 %v1863_v13, %s2294_s11 }
 0x307   : > { %v1102_v19 = vmax.f32 %v1038_v59, %v1087_v18  ;;  %v1993_v20 = vpop.f32.mrb[26].mxu1 }
 0x308   : > { %v1869_v21 = vpack.c.bf16 %v1104_v17, %v1104_v17  ;;  %v1105_v22 = vmax.f32 %v1987_v60, %v1993_v20  ;;  %v1090_v23 = vpop.f32.mrb[27].mxu1  ;;  %955 = vrot.lane.b32.xlu1 %v1864_v16, %s2294_s11  ;;  %s2297_s11 = smov [#allocation5]  }
 0x309   : > { %v1103_v24 = vmax.f32 %v1041_v62, %v1090_v23  ;;  %v2010_v25 = vpop.f32.mrb[28].mxu0  ;;  %v1867_v29 = vpack.c.bf16 %v1102_v19, %v1102_v19 }
 0x30a   : > { %v1870_v26 = vpack.c.bf16 %v1105_v22, %v1105_v22  ;;  %1127 = vrot.lane.b32.xlu0 %v1869_v21, %s2291_s9  ;;  %v1322_v27 = vpop.f32.mrb[29].mxu0 }
 0x30b   : > { %v2011_v28 = vpop.f32.mrb[30].mxu0  ;;  %v1868_v32 = vpack.c.bf16 %v1103_v24, %v1103_v24 }
 0x30c   : > { %v1325_v30 = vpop.f32.mrb[31].mxu0  ;;  %1129 = vrot.lane.b32.xlu1 %v1870_v26, %s2291_s9 }
 0x30d   : > { %v2004_v31 = vpop.f32.mrb[28].mxu1 }
 0x30e   : > { %v1247_v33 = vmax.f32 %v1998_v9, %v2004_v31  ;;  %v1230_v34 = vpop.f32.mrb[29].mxu1  ;;  %1112 = vrot.lane.b32.xlu0 %v1867_v29, %s2291_s9 }
 0x30f   : > { %v1245_v35 = vmax.f32 %v1181_v11, %v1230_v34  ;;  %v2005_v36 = vpop.f32.mrb[30].mxu1 }
 0x310   : > { %v1873_v37 = vpack.c.bf16 %v1247_v33, %v1247_v33  ;;  %v1248_v38 = vmax.f32 %v1999_v12, %v2005_v36  ;;  %v1233_v39 = vpop.f32.mrb[31].mxu1  ;;  %1114 = vrot.lane.b32.xlu1 %v1868_v32, %s2291_s9 }
 0x311   : > { %v1246_v40 = vmax.f32 %v1184_v14, %v1233_v39  ;;  %v2022_v41 = vpop.f32.mrb[32].mxu0  ;;  %v1871_v45 = vpack.c.bf16 %v1245_v35, %v1245_v35 }
 0x312   : > { %v1874_v42 = vpack.c.bf16 %v1248_v38, %v1248_v38  ;;  %1270 = vrot.lane.b32.xlu0 %v1873_v37, %s2295_s13  ;;  %v1463_v43 = vpop.f32.mrb[33].mxu0 }
 0x313   : > { %v2023_v44 = vpop.f32.mrb[34].mxu0  ;;  %v1872_v48 = vpack.c.bf16 %v1246_v40, %v1246_v40 }
 0x314   : > { %v1466_v46 = vpop.f32.mrb[35].mxu0  ;;  %1272 = vrot.lane.b32.xlu1 %v1874_v42, %s2295_s13 }
 0x315   : > { %v2016_v47 = vpop.f32.mrb[32].mxu1 }
 0x316   : > { %v1388_v49 = vmax.f32 %v2010_v25, %v2016_v47  ;;  %v1371_v50 = vpop.f32.mrb[33].mxu1  ;;  %1255 = vrot.lane.b32.xlu0 %v1871_v45, %s2295_s13 }
 0x317   : > { %v1386_v51 = vmax.f32 %v1322_v27, %v1371_v50  ;;  %v2017_v52 = vpop.f32.mrb[34].mxu1 }
 0x318   : > { %v1877_v53 = vpack.c.bf16 %v1388_v49, %v1388_v49  ;;  %v1389_v54 = vmax.f32 %v2011_v28, %v2017_v52  ;;  %v1374_v55 = vpop.f32.mrb[35].mxu1  ;;  %1257 = vrot.lane.b32.xlu1 %v1872_v48, %s2295_s13  ;;  %s2160_s13 = sshll.u32 %s2297_s11, 4  ;;  %s2161_s13 = int_to_ptr.vmem [resolvable:$false] %s2160_s13 }
 0x319   : > { %v1387_v56 = vmax.f32 %v1325_v30, %v1374_v55  ;;  %v1875_v58 = vpack.c.bf16 %v1386_v51, %v1386_v51  ;;  %s2162_s23 = scalar_lea.vmem %s2161_s13, 512  ;;  %p2163_p8 = scmp.lt.s32.totalorder %s2576_s17, %s2161_s13 }
 0x31a   : > { %v1878_v57 = vpack.c.bf16 %v1389_v54, %v1389_v54  ;;  %1411 = vrot.lane.b32.xlu0 %v1877_v53, %s2296_s25  ;;  %p2164_p10 = scmp.lt.s32.totalorder %s2162_s23, %s2156_s10 }
 0x31b   : > { %v1876_v60 = vpack.c.bf16 %v1387_v56, %v1387_v56 }
 0x31c   : > { %1413 = vrot.lane.b32.xlu1 %v1878_v57, %s2296_s25  ;;  %p2165_p0 = por %p2164_p10, %p2163_p8 }
 0x31d   : > { %v2028_v59 = vpop.f32.mrb[36].mxu1 }
 0x31e   : > { %v1529_v61 = vmax.f32 %v2022_v41, %v2028_v59  ;;  %v1512_v62 = vpop.f32.mrb[37].mxu1  ;;  %1396 = vrot.lane.b32.xlu0 %v1875_v58, %s2296_s25  ;;  %p2166_p2 = pnand %p2165_p0, %p2159_p13 }
 0x31f   : > { %v1527_v63 = vmax.f32 %v1463_v43, %v1512_v62  ;;  %v2029_v0 = vpop.f32.mrb[38].mxu1 }
 0x320   : > { %2169 = shalt.err (!%p2166_p2)
}
 0x321   : > { %s2170_s28 = scalar_lea.hbm %s2584_s29, 256  ;;  %s2174_s11 = scalar_lea.hbm %s2743_s3, 512 }
 0x322   : > { %p2171_p4 = scmp.ne.s32.totalorder %s2584_s29, %s2170_s28  ;;  %p2175_p9 = scmp.lt.u32.totalorder %s2584_s29, %s2743_s3 }
 0x323   : > { %p2176_p1 = scmp.lt.u32.totalorder %s2174_s11, %s2170_s28  ;;  %p2178_p6 = scmp.lt.u32.totalorder %s2170_s28, %s2584_s29 }
 0x324   : > { %p2172_p5 = pnand %p2171_p4, %p2755_p11 }
 0x325   : > { %p2177_p3 = por %p2176_p1, %p2175_p9 }
 0x326   : > { %p2173_p7 = pneg %p2172_p5 }
 0x327   : > { %p2179_p12 = por %p2178_p6, %p2177_p3 }
 0x329   : > { %p2180_p13 = pnand %p2179_p12, %p2173_p7 }
 0x32b   : > { %2183 = shalt.err (!%p2180_p13)
}
 0x32c   : > { %s2298_s23 = smov 128   ;;  %v1881_v1 = vpack.c.bf16 %v1529_v61, %v1529_v61  ;;  %v1530_v2 = vmax.f32 %v2023_v44, %v2029_v0  ;;  %v1515_v3 = vpop.f32.mrb[39].mxu1  ;;  %1398 = vrot.lane.b32.xlu1 %v1876_v60, %s2296_s25  ;;  %s2299_s8 = smov 56   ;;  %v1879_v6 = vpack.c.bf16 %v1527_v63, %v1527_v63  ;;  %vm677_vm3 = vcmask 126016  }
 0x32d   : > { %2032 = dma.vmem_to_hbm [thread:$0]  (%p2755_p11), %s2576_s17, 256, %s2584_s29, %s1561_s14, %s2298_s23, %s2298_s23, %s2292_s7   ;;  %v1528_v4 = vmax.f32 %v1466_v46, %v1515_v3  ;;  %vm818_vm4 = vcmask 191616   ;;  %vm959_vm5 = vcmask 257216   ;;  %vm1118_vm6 = vcmask 322816  }
 0x32e   : > { %v1882_v5 = vpack.c.bf16 %v1530_v2, %v1530_v2  ;;  %1552 = vrot.lane.b32.xlu0 %v1881_v1, %s2299_s8  ;;  %vm1261_vm7 = vcmask 388416   ;;  %vm1402_vm8 = vcmask 454016   ;;  %s1565_s26 = sand.u32 1, %s2354_s22   ;;  %s1884_s7 = sshll.u32 %s2354_s22, 7  ;;  %vm1543_vm9 = vcmask 519616  }
 0x32f   : > { %v1880_v7 = vpack.c.bf16 %v1528_v4, %v1528_v4  ;;  %s1600_s17 = sshll.u32 %s2558_s15, 4  ;;  %s2644_s14 = scalar_lea.hbm %s2744_s4, %s1884_s7  ;;  %s2648_s17 = int_to_ptr.vmem [resolvable:$true] %s1600_s17 }
 0x330   : > { %1554 = vrot.lane.b32.xlu1 %v1882_v5, %s2299_s8  ;;  %s1616_s10 = sshll.u32 %s2561_s16, 4  ;;  %s2653_s28 = scalar_lea.sflag [#allocation7], %s1565_s26  ;;  %s2691_s10 = int_to_ptr.vmem [resolvable:$true] %s1616_s10 }
 0x331   : > { %s2184_s9 = scalar_lea.vmem %s2648_s17, 128  ;;  %s2300_s12 = smov [#allocation6]  }
 0x332   : > { %1537 = vrot.lane.b32.xlu0 %v1879_v6, %s2299_s8  ;;  %p2185_p8 = scmp.ne.s32.totalorder %s2648_s17, %s2184_s9  ;;  %s2188_s11 = sshll.u32 %s2300_s12, 4  ;;  %s2189_s11 = int_to_ptr.vmem [resolvable:$false] %s2188_s11 }
 0x333   : > { %s2190_s13 = scalar_lea.vmem %s2189_s11, 256  ;;  %p2191_p2 = scmp.lt.s32.totalorder %s2648_s17, %s2189_s11 }
 0x334   : > { %1539 = vrot.lane.b32.xlu1 %v1880_v7, %s2299_s8  ;;  %p2186_p10 = pnand %p2185_p8, %p2755_p11  ;;  %p2192_p4 = scmp.lt.s32.totalorder %s2190_s13, %s2184_s9 }
 0x336   : > { %p2187_p0 = pneg %p2186_p10  ;;  %p2193_p5 = por %p2192_p4, %p2191_p2 }
 0x338   : > { %p2194_p7 = pnand %p2193_p5, %p2187_p0 }
 0x364   : > { %v687_v8 = vpop.permute.xlu0 %686 }
 0x365   : > { %692 = vst.msk [vmem:[%s2558_s15] sm:$0xf] %vm677_vm3, %v687_v8 }
 0x366   : > { %v689_v9 = vpop.permute.xlu1 %688 }
 0x367   : > { %693 = vst.msk [vmem:[%s2558_s15 + $0x4] sm:$0xf] %vm677_vm3, %v689_v9 }
 0x368   : > { %v672_v10 = vpop.permute.xlu0 %671 }
 0x369   : > { %678 = vst.msk [vmem:[%s2561_s16] sm:$0xf] %vm677_vm3, %v672_v10 }
 0x36a   : > { %v674_v11 = vpop.permute.xlu1 %673 }
 0x36b   : > { %679 = vst.msk [vmem:[%s2561_s16 + $0x4] sm:$0xf] %vm677_vm3, %v674_v11 }
 0x36c   : > { %v828_v12 = vpop.permute.xlu0 %827 }
 0x36d   : > { %833 = vst.msk [vmem:[%s2558_s15] sm:$0xf] %vm818_vm4, %v828_v12 }
 0x36e   : > { %v830_v13 = vpop.permute.xlu1 %829 }
 0x36f   : > { %834 = vst.msk [vmem:[%s2558_s15 + $0x4] sm:$0xf] %vm818_vm4, %v830_v13 }
 0x370   : > { %v813_v14 = vpop.permute.xlu0 %812 }
 0x371   : > { %819 = vst.msk [vmem:[%s2561_s16] sm:$0xf] %vm818_vm4, %v813_v14 }
 0x372   : > { %v815_v15 = vpop.permute.xlu1 %814 }
 0x373   : > { %820 = vst.msk [vmem:[%s2561_s16 + $0x4] sm:$0xf] %vm818_vm4, %v815_v15 }
 0x374   : > { %v969_v16 = vpop.permute.xlu0 %968 }
 0x375   : > { %974 = vst.msk [vmem:[%s2558_s15] sm:$0xf] %vm959_vm5, %v969_v16 }
 0x376   : > { %v971_v17 = vpop.permute.xlu1 %970 }
 0x377   : > { %975 = vst.msk [vmem:[%s2558_s15 + $0x4] sm:$0xf] %vm959_vm5, %v971_v17 }
 0x378   : > { %v954_v18 = vpop.permute.xlu0 %953 }
 0x379   : > { %960 = vst.msk [vmem:[%s2561_s16] sm:$0xf] %vm959_vm5, %v954_v18 }
 0x37a   : > { %v956_v19 = vpop.permute.xlu1 %955 }
 0x37b   : > { %961 = vst.msk [vmem:[%s2561_s16 + $0x4] sm:$0xf] %vm959_vm5, %v956_v19 }
 0x37c   : > { %v1128_v20 = vpop.permute.xlu0 %1127 }
 0x37d   : > { %1133 = vst.msk [vmem:[%s2558_s15] sm:$0xf] %vm1118_vm6, %v1128_v20 }
 0x37e   : > { %v1130_v21 = vpop.permute.xlu1 %1129 }
 0x37f   : > { %1134 = vst.msk [vmem:[%s2558_s15 + $0x4] sm:$0xf] %vm1118_vm6, %v1130_v21 }
 0x380   : > { %v1113_v22 = vpop.permute.xlu0 %1112 }
 0x381   : > { %1119 = vst.msk [vmem:[%s2561_s16] sm:$0xf] %vm1118_vm6, %v1113_v22 }
 0x382   : > { %v1115_v23 = vpop.permute.xlu1 %1114 }
 0x383   : > { %1120 = vst.msk [vmem:[%s2561_s16 + $0x4] sm:$0xf] %vm1118_vm6, %v1115_v23 }
 0x384   : > { %v1271_v24 = vpop.permute.xlu0 %1270 }
 0x385   : > { %1276 = vst.msk [vmem:[%s2558_s15] sm:$0xf] %vm1261_vm7, %v1271_v24 }
 0x386   : > { %v1273_v25 = vpop.permute.xlu1 %1272 }
 0x387   : > { %1277 = vst.msk [vmem:[%s2558_s15 + $0x4] sm:$0xf] %vm1261_vm7, %v1273_v25 }
 0x388   : > { %v1256_v26 = vpop.permute.xlu0 %1255 }
 0x389   : > { %1262 = vst.msk [vmem:[%s2561_s16] sm:$0xf] %vm1261_vm7, %v1256_v26 }
 0x38a   : > { %v1258_v27 = vpop.permute.xlu1 %1257 }
 0x38b   : > { %1263 = vst.msk [vmem:[%s2561_s16 + $0x4] sm:$0xf] %vm1261_vm7, %v1258_v27 }
 0x38c   : > { %v1412_v28 = vpop.permute.xlu0 %1411 }
 0x38d   : > { %1417 = vst.msk [vmem:[%s2558_s15] sm:$0xf] %vm1402_vm8, %v1412_v28 }
 0x38e   : > { %v1414_v29 = vpop.permute.xlu1 %1413 }
 0x38f   : > { %1418 = vst.msk [vmem:[%s2558_s15 + $0x4] sm:$0xf] %vm1402_vm8, %v1414_v29 }
 0x390   : > { %v1397_v30 = vpop.permute.xlu0 %1396 }
 0x391   : > { %1403 = vst.msk [vmem:[%s2561_s16] sm:$0xf] %vm1402_vm8, %v1397_v30 }
 0x39e   : > { %v1399_v31 = vpop.permute.xlu1 %1398 }
 0x39f   : > { %1404 = vst.msk [vmem:[%s2561_s16 + $0x4] sm:$0xf] %vm1402_vm8, %v1399_v31 }
 0x3a0   : > { %v1553_v32 = vpop.permute.xlu0 %1552 }
 0x3a1   : > { %1558 = vst.msk [vmem:[%s2558_s15] sm:$0xf] %vm1543_vm9, %v1553_v32 }
 0x3a2   : > { %v1555_v33 = vpop.permute.xlu1 %1554 }
 0x3a3   : > { %1559 = vst.msk [vmem:[%s2558_s15 + $0x4] sm:$0xf] %vm1543_vm9, %v1555_v33 }
 0x3a4   : > { %v1538_v34 = vpop.permute.xlu0 %1537 }
 0x3a5   : > { %2197 = shalt.err (!%p2194_p7)
}
 0x3a6   : > { %s2198_s15 = scalar_lea.hbm %s2644_s14, 128  ;;  %s2202_s26 = scalar_lea.hbm %s2744_s4, 256 }
 0x3a7   : > { %p2199_p9 = scmp.ne.s32.totalorder %s2644_s14, %s2198_s15  ;;  %p2203_p6 = scmp.lt.u32.totalorder %s2644_s14, %s2744_s4 }
 0x3a8   : > { %p2204_p12 = scmp.lt.u32.totalorder %s2202_s26, %s2198_s15  ;;  %p2206_p8 = scmp.lt.u32.totalorder %s2198_s15, %s2644_s14 }
 0x3a9   : > { %p2200_p1 = pnand %p2199_p9, %p2755_p11 }
 0x3aa   : > { %p2205_p13 = por %p2204_p12, %p2203_p6 }
 0x3ab   : > { %p2201_p3 = pneg %p2200_p1 }
 0x3ac   : > { %p2207_p10 = por %p2206_p8, %p2205_p13 }
 0x3ae   : > { %p2208_p0 = pnand %p2207_p10, %p2201_p3 }
 0x3b0   : > { %2211 = shalt.err (!%p2208_p0)
}
 0x3b1   : > { %s2301_s9 = smov 4   ;;  %s2756_s12 = smov 64   ;;  %1544 = vst.msk [vmem:[%s2561_s16] sm:$0xf] %vm1543_vm9, %v1538_v34  ;;  %v1540_v35 = vpop.permute.xlu1 %1539 }
 0x3b2   : > { %2033 = dma.vmem_to_hbm [thread:$0]  (%p2755_p11), %s2648_s17, 128, %s2644_s14, %s2653_s28, %s2756_s12, %s2756_s12, %s2301_s9  }
 0x3b3   : > { %s2687_s15 = scalar_lea.hbm %s2745_s5, %s1884_s7  ;;  %1545 = vst.msk [vmem:[%s2561_s16 + $0x4] sm:$0xf] %vm1543_vm9, %v1540_v35  ;;  %s2212_s23 = scalar_lea.vmem %s2691_s10, 128 }
 0x3b4   : > { %p2213_p2 = scmp.ne.s32.totalorder %s2691_s10, %s2212_s23  ;;  %s2302_s22 = smov [#allocation8]  }
 0x3b5   : > { %s2216_s17 = sshll.u32 %s2302_s22, 4  ;;  %s2217_s17 = int_to_ptr.vmem [resolvable:$false] %s2216_s17 }
 0x3b6   : > { %p2214_p4 = pnand %p2213_p2, %p2755_p11  ;;  %s2218_s14 = scalar_lea.vmem %s2217_s17, 256 }
 0x3b7   : > { %p2219_p7 = scmp.lt.s32.totalorder %s2691_s10, %s2217_s17  ;;  %p2220_p9 = scmp.lt.s32.totalorder %s2218_s14, %s2212_s23 }
 0x3b8   : > { %p2215_p5 = pneg %p2214_p4 }
 0x3b9   : > { %p2221_p1 = por %p2220_p9, %p2219_p7 }
 0x3bb   : > { %p2222_p3 = pnand %p2221_p1, %p2215_p5 }
 0x3bd   : > { %2225 = shalt.err (!%p2222_p3)
}
 0x3be   : > { %s2226_s16 = scalar_lea.hbm %s2687_s15, 128  ;;  %s2230_s26 = scalar_lea.hbm %s2745_s5, 256 }
 0x3bf   : > { %p2227_p6 = scmp.ne.s32.totalorder %s2687_s15, %s2226_s16  ;;  %p2231_p8 = scmp.lt.u32.totalorder %s2687_s15, %s2745_s5 }
 0x3c0   : > { %p2232_p10 = scmp.lt.u32.totalorder %s2230_s26, %s2226_s16  ;;  %p2234_p2 = scmp.lt.u32.totalorder %s2226_s16, %s2687_s15 }
 0x3c1   : > { %p2228_p12 = pnand %p2227_p6, %p2755_p11 }
 0x3c2   : > { %p2233_p0 = por %p2232_p10, %p2231_p8 }
 0x3c3   : > { %p2229_p13 = pneg %p2228_p12 }
 0x3c4   : > { %p2235_p4 = por %p2234_p2, %p2233_p0 }
 0x3c6   : > { %p2236_p5 = pnand %p2235_p4, %p2229_p13 }
 0x3c8   : > { %2239 = shalt.err (!%p2236_p5)
}
 0x3c9   : > { %2034 = dma.vmem_to_hbm [thread:$0]  (%p2755_p11), %s2691_s10, 128, %s2687_s15, %s2653_s28, %s2756_s12, %s2756_s12, %s2301_s9  }
 0x3ca PF: > { %s1631_s11 = sand.u32 1, %s2270_s18   ;;  %p2757_p7 = scmp.ne.s32.totalorder %s2753_s6, 0 }
 0x3cb   : > { %p2758_p9 = scmp.ge.s32.totalorder %s2282_s21, 2  ;;  %s1632_s13 = scalar_lea.sflag [#allocation4], %s1631_s11 }
 0x3cd   : > { %p2043_p1 = pnand %p2758_p9, %p2757_p7 }
 0x3cf   : > { %2261 = dma.done.wait (!%p2043_p1), %s1632_s13, 256  }
 0x3d0   : > { %2263 = vsyncadd (!%p2043_p1), %s1632_s13, 4294967040  ;;  %s2759_s30 = sadd.s32 4294967294, %s2282_s21  }
 0x3d1   : > { %s1640_s23 = sand.u32 1, %s2759_s30  }
 0x3d2   : > { %s1641_s22 = scalar_lea.sflag [#allocation7], %s1640_s23 }
 0x3d3   : > { %2265 = dma.done.wait (!%p2043_p1), %s1641_s22, 256  }
 0x3d4   : > { %2267 = vsyncadd (!%p2043_p1), %s1641_s22, 4294967040  ;;  %p22_p11 = scmp.ge.s32.totalorder %s2358_s24, 4   ;;  %s2760_s18 = smov %s2274_s19 }
 0x3d5   : > { %s2761_s19 = smov %s2278_s20  ;;  %s2762_s20 = smov %s2370_s27 }
 0x3d6   : > { %s2763_s21 = smov %s2358_s24  ;;  %24 = sbr.rel (!%p22_p11) target bundleno = 7 (0x7), region = 110 }
 0x3dd   :  { %1655 = vsyncpa [#allocation3], 1 }
 0x3de   :  { %1657 = vsyncpa [#allocation3 + $0x1], 1 }
 0x3df   :  { %1658 = vsyncpa [#allocation4], 1 }
 0x3e0   :  { %1660 = vsyncpa [#allocation4 + $0x1], 1 }
 0x3e1   :  { %1661 = vsyncpa [#allocation7], 1 }
 0x3e2   :  { %1663 = vsyncpa [#allocation7 + $0x1], 1 }

</bundles_post_ra>
